<compile_context>
chip_gen: v5e
topology: v5e:2x2
jax: 0.10.0
libtpu: 0.0.40
codegen_flags: <defaults>
</compile_context>

<pallas_src>
import functools

import jax
import jax.numpy as jnp
from jax.experimental import pallas as pl
from jax.experimental.pallas import tpu as pltpu


# ---------------------------------------------------------------------------
# miniature MobileNetV3 dimensions
# ---------------------------------------------------------------------------
IN_CH = 3
K_PAD = 32          # stem im2col K: 9 * 3 = 27, padded to 32 (sublane aligned)
STEM_CH = 16
EXP_CH = 32
SE_CH = 8
HEAD_CH = 64
FC1_CH = 96
NUM_CLASSES = 10
CLS_PAD = 32        # classes padded so the logits slab is B_TILE*32 = 128 lanes

# Images packed per grid step.  4 makes the expand/dw/SE section exactly
# 128 lanes wide (full vreg) on every TPU generation and keeps grid >= 2 at
# N=8 (both v7x TensorCores busy).  Use 2 on v5e if MXU-row fill matters more.
B_TILE = 4

_VMEM_LIMIT = 32 * 1024 * 1024


def _hardswish(x):
    return x * jnp.clip(x + 3.0, 0.0, 6.0) * (1.0 / 6.0)


def _hardsigmoid(x):
    return jnp.clip(x + 3.0, 0.0, 6.0) * (1.0 / 6.0)


# ---------------------------------------------------------------------------
# The single fused kernel: stem -> expand -> depthwise 3x3 -> SE -> project
# -> residual -> head -> global pool -> fc1 -> fc2, for B_TILE images.
# ---------------------------------------------------------------------------
def fused_mnv3_kernel(
        patch_ref,
        stem_w_ref, stem_b_ref, exp_w_ref, exp_b_ref,
        dw_w_ref, dw_b_ref, se1_w_ref, se1_b_ref, se2_w_ref, se2_b_ref,
        proj_w_ref, proj_b_ref, head_w_ref, head_b_ref,
        fc1_w_ref, fc1_b_ref, fc2_w_ref, fc2_b_ref,
        out_ref, pad_ref, *, ho, wo):
    """One grid step == B_TILE images, lane-packed as [img0 ch | img1 ch | ...].

    patch_ref : (HW, B_TILE*K_PAD)            bf16  stem im2col patches
    out_ref   : (1, B_TILE*CLS_PAD)           f32   lane-dense padded logits
    pad_ref   : (ho+2, wo+2, B_TILE*EXP_CH)   f32   zero-haloed dw scratch
    All matmul weights are block-diagonal kron(I_B, W) so every image stays in
    its own lane group; biases / dw weights are lane-tiled.
    """
    f32, bf16 = jnp.float32, jnp.bfloat16
    hw = ho * wo
    lanes = pad_ref.shape[-1]                       # B_TILE * EXP_CH (=128)

    # --- stem 3x3 s2 conv (im2col matmul) + hardswish ------------------------
    stem = jnp.dot(patch_ref[...], stem_w_ref[...], preferred_element_type=f32)
    stem = _hardswish(stem + stem_b_ref[...])       # (HW, B*16)

    # --- expand 1x1 + hardswish ----------------------------------------------
    exp = jnp.dot(stem.astype(bf16), exp_w_ref[...], preferred_element_type=f32)
    exp = _hardswish(exp + exp_b_ref[...])          # (HW, B*32) = (HW, 128)

    # --- depthwise 3x3 (stride 1, zero pad 1): halo scratch + 9 static taps --
    # Only the halo ring is zeroed (interior fully overwritten every step).
    pad_ref[0:1, :, :] = jnp.zeros((1, wo + 2, lanes), f32)
    pad_ref[ho + 1:ho + 2, :, :] = jnp.zeros((1, wo + 2, lanes), f32)
    pad_ref[:, 0:1, :] = jnp.zeros((ho + 2, 1, lanes), f32)
    pad_ref[:, wo + 1:wo + 2, :] = jnp.zeros((ho + 2, 1, lanes), f32)
    pad_ref[1:ho + 1, 1:wo + 1, :] = exp.reshape(ho, wo, lanes)

    acc = jnp.zeros((ho, wo, lanes), f32)
    k = 0
    for oi in range(3):
        for oj in range(3):
            tap = pad_ref[oi:oi + ho, oj:oj + wo, :]          # (ho, wo, lanes)
            acc = acc + tap * dw_w_ref[k:k + 1, :]            # lane-tiled w
            k += 1
    dw = _hardswish(acc + dw_b_ref[...])            # (ho, wo, lanes)
    dw = dw.reshape(hw, lanes)

    # --- squeeze-excite (per image: lane packing + block-diag FCs) -----------
    pooled = jnp.mean(dw, axis=0, keepdims=True)    # (1, lanes)
    se = jnp.dot(pooled.astype(bf16), se1_w_ref[...], preferred_element_type=f32)
    se = jnp.maximum(se + se1_b_ref[...], 0.0)      # (1, B*8)
    se = jnp.dot(se.astype(bf16), se2_w_ref[...], preferred_element_type=f32)
    se = _hardsigmoid(se + se2_b_ref[...])          # (1, lanes)
    gated = dw * se                                 # (HW, lanes)

    # --- project 1x1, fused residual with stem --------------------------------
    proj = jnp.dot(gated.astype(bf16), proj_w_ref[...], preferred_element_type=f32)
    block = proj + proj_b_ref[...] + stem           # (HW, B*16)

    # --- head 1x1 + hardswish + global average pool ---------------------------
    head = jnp.dot(block.astype(bf16), head_w_ref[...], preferred_element_type=f32)
    head = _hardswish(head + head_b_ref[...])       # (HW, B*64)
    feat = jnp.mean(head, axis=0, keepdims=True)    # (1, B*64)

    # --- fused classifier tail: fc1 + hardswish + fc2 (classes padded to 32) --
    h = jnp.dot(feat.astype(bf16), fc1_w_ref[...], preferred_element_type=f32)
    h = _hardswish(h + fc1_b_ref[...])              # (1, B*96)
    y = jnp.dot(h.astype(bf16), fc2_w_ref[...], preferred_element_type=f32)
    out_ref[...] = y + fc2_b_ref[...]               # (1, B*CLS_PAD) = (1, 128)


# ---------------------------------------------------------------------------
# pallas_call wrapper
# ---------------------------------------------------------------------------
def _const_spec(shape):
    """Whole-array block whose index is constant across the grid."""
    nd = len(shape)
    return pl.BlockSpec(shape, lambda *_, _nd=nd: (0,) * _nd)


def fused_forward(packed_patches, packed_weights, ho, wo):
    nb, hw, in_lanes = packed_patches.shape
    out_lanes = B_TILE * CLS_PAD
    in_specs = ([pl.BlockSpec((None, hw, in_lanes), lambda b: (b, 0, 0))]
                + [_const_spec(w.shape) for w in packed_weights])
    out = pl.pallas_call(
        functools.partial(fused_mnv3_kernel, ho=ho, wo=wo),
        grid=(nb,),
        in_specs=in_specs,
        out_specs=pl.BlockSpec((None, 1, out_lanes), lambda b: (b, 0, 0)),
        out_shape=jax.ShapeDtypeStruct((nb, 1, out_lanes), jnp.float32),
        scratch_shapes=[pltpu.VMEM((ho + 2, wo + 2, B_TILE * EXP_CH),
                                   jnp.float32)],
        compiler_params=pltpu.CompilerParams(
            dimension_semantics=("parallel",),   # v7x: steps sharded over 2 TCs
            vmem_limit_bytes=_VMEM_LIMIT),
    )(packed_patches, *packed_weights)
    return out.reshape(nb, out_lanes)


# ---------------------------------------------------------------------------
# Host-side packing: im2col, lane packing, block-diagonal weights
# ---------------------------------------------------------------------------
def stem_im2col(x_nhwc, stride=2, pad=1):
    """3x3 stem patches, K padded 27 -> K_PAD, stored bf16."""
    n, h, w, c = x_nhwc.shape
    xp = jnp.pad(x_nhwc, ((0, 0), (pad, pad), (pad, pad), (0, 0)))
    ho = (h + 2 * pad - 3) // stride + 1
    wo = (w + 2 * pad - 3) // stride + 1
    taps = [xp[:, i:i + stride * ho:stride, j:j + stride * wo:stride, :]
            for i in range(3) for j in range(3)]
    p = jnp.stack(taps, axis=3).reshape(n, ho * wo, 9 * c)
    p = jnp.pad(p, ((0, 0), (0, 0), (0, K_PAD - 9 * c)))
    return p.astype(jnp.bfloat16), (ho, wo)


def _pack_params(params, b_tile):
    """Block-diagonal matmul weights / lane-tiled biases for lane packing."""
    eye = jnp.eye(b_tile, dtype=jnp.float32)

    def bd(w):                                    # (Ci,Co) -> (B*Ci,B*Co) bf16
        return jnp.kron(eye, w.astype(jnp.float32)).astype(jnp.bfloat16)

    def tile(v):                                  # (R,C)  -> (R,B*C)     f32
        return jnp.tile(v.astype(jnp.float32), (1, b_tile))

    fc2_w = jnp.pad(params["fc2_w"].astype(jnp.float32),
                    ((0, 0), (0, CLS_PAD - NUM_CLASSES)))
    fc2_b = jnp.pad(params["fc2_b"].astype(jnp.float32),
                    ((0, 0), (0, CLS_PAD - NUM_CLASSES)))
    return (
        bd(params["stem_w"]), tile(params["stem_b"]),
        bd(params["exp_w"]), tile(params["exp_b"]),
        tile(params["dw_w"]), tile(params["dw_b"]),
        bd(params["se1_w"]), tile(params["se1_b"]),
        bd(params["se2_w"]), tile(params["se2_b"]),
        bd(params["proj_w"]), tile(params["proj_b"]),
        bd(params["head_w"]), tile(params["head_b"]),
        bd(params["fc1_w"]), tile(params["fc1_b"]),
        jnp.kron(eye, fc2_w).astype(jnp.bfloat16), jnp.tile(fc2_b, (1, b_tile)),
    )


# ---------------------------------------------------------------------------
# Parameters (deterministic init, bf16 storage) and forward
# ---------------------------------------------------------------------------
def init_params(key):
    def nrm(k, shape, scale=0.05):
        return (scale * jax.random.normal(k, shape, jnp.float32)
                ).astype(jnp.bfloat16)

    ks = jax.random.split(key, 16)
    return {
        "stem_w": nrm(ks[0], (K_PAD, STEM_CH)),   # rows 27..31 meet zero-padded K
        "stem_b": nrm(ks[1], (1, STEM_CH)),
        "exp_w": nrm(ks[2], (STEM_CH, EXP_CH)), "exp_b": nrm(ks[3], (1, EXP_CH)),
        "dw_w": nrm(ks[4], (9, EXP_CH)), "dw_b": nrm(ks[5], (1, EXP_CH)),
        "se1_w": nrm(ks[6], (EXP_CH, SE_CH)), "se1_b": nrm(ks[7], (1, SE_CH)),
        "se2_w": nrm(ks[8], (SE_CH, EXP_CH)), "se2_b": nrm(ks[9], (1, EXP_CH)),
        "proj_w": nrm(ks[10], (EXP_CH, STEM_CH)),
        "proj_b": nrm(ks[11], (1, STEM_CH)),
        "head_w": nrm(ks[12], (STEM_CH, HEAD_CH)),
        "head_b": nrm(ks[13], (1, HEAD_CH)),
        "fc1_w": nrm(ks[14], (HEAD_CH, FC1_CH)),
        "fc1_b": jnp.zeros((1, FC1_CH), jnp.bfloat16),
        "fc2_w": nrm(ks[15], (FC1_CH, NUM_CLASSES)),
        "fc2_b": jnp.zeros((1, NUM_CLASSES), jnp.bfloat16),
    }


@jax.jit
def mobilenetv3_regular_forward(params, x_nchw):
    # PyTorch NCHW -> NHWC once at the boundary.
    x = jnp.transpose(x_nchw, (0, 2, 3, 1)).astype(jnp.float32)
    n = x.shape[0]
    patches, (ho, wo) = stem_im2col(x)                       # (N, HW, 32) bf16
    hw = ho * wo

    # Pad batch to a multiple of B_TILE, pack B_TILE images along lanes.
    n_pad = (-n) % B_TILE
    if n_pad:
        patches = jnp.pad(patches, ((0, n_pad), (0, 0), (0, 0)))
    nb = (n + n_pad) // B_TILE
    packed = patches.reshape(nb, B_TILE, hw, K_PAD)
    packed = packed.transpose(0, 2, 1, 3).reshape(nb, hw, B_TILE * K_PAD)

    weights = _pack_params(params, B_TILE)
    logits_packed = fused_forward(packed, weights, ho, wo)   # (nb, B*CLS_PAD)
    logits = logits_packed.reshape(nb * B_TILE, CLS_PAD)[:n, :NUM_CLASSES]

    # Same output structure as MobilenetV3Regular.forward.
    # TODO(synk): compress() (JPEG/PIL entropy path) has no Pallas equivalent.
    return {
        "y_hat": logits,
        "strings": None,
        "likelihoods": None,
        "compression_loss": jnp.float32(0.0),
    }


if __name__ == "__main__":
    key = jax.random.PRNGKey(0)
    pkey, xkey = jax.random.split(key)
    params = init_params(pkey)
    # N=8 -> 2 grid steps of B_TILE=4 images (keeps both v7x TCs busy).
    x = jax.random.normal(xkey, (8, IN_CH, 16, 16), jnp.float32)   # NCHW

    out = mobilenetv3_regular_forward(params, x)
    jax.block_until_ready(out["y_hat"])
    jax.block_until_ready(out["compression_loss"])
    assert out["y_hat"].shape == (8, NUM_CLASSES)
    assert out["strings"] is None and out["likelihoods"] is None
    assert bool(jnp.all(jnp.isfinite(out["y_hat"])))
    print("KERNEL_OK")
</pallas_src>

<mosaic_0001>
module attributes {stable_mosaic.version = 11 : i64} {
  func.func @fused_mnv3_kernel(%arg0: i32, %arg1: memref<1x64x128xbf16, #tpu.memory_space<vmem>>, %arg2: memref<128x64xbf16, #tpu.memory_space<vmem>>, %arg3: memref<1x64xf32, #tpu.memory_space<vmem>>, %arg4: memref<64x128xbf16, #tpu.memory_space<vmem>>, %arg5: memref<1x128xf32, #tpu.memory_space<vmem>>, %arg6: memref<9x128xf32, #tpu.memory_space<vmem>>, %arg7: memref<1x128xf32, #tpu.memory_space<vmem>>, %arg8: memref<128x32xbf16, #tpu.memory_space<vmem>>, %arg9: memref<1x32xf32, #tpu.memory_space<vmem>>, %arg10: memref<32x128xbf16, #tpu.memory_space<vmem>>, %arg11: memref<1x128xf32, #tpu.memory_space<vmem>>, %arg12: memref<128x64xbf16, #tpu.memory_space<vmem>>, %arg13: memref<1x64xf32, #tpu.memory_space<vmem>>, %arg14: memref<64x256xbf16, #tpu.memory_space<vmem>>, %arg15: memref<1x256xf32, #tpu.memory_space<vmem>>, %arg16: memref<256x384xbf16, #tpu.memory_space<vmem>>, %arg17: memref<1x384xf32, #tpu.memory_space<vmem>>, %arg18: memref<384x128xbf16, #tpu.memory_space<vmem>>, %arg19: memref<1x128xf32, #tpu.memory_space<vmem>>, %arg20: memref<1x1x128xf32, #tpu.memory_space<vmem>>, %arg21: memref<10x10x128xf32, #tpu.memory_space<vmem>>) attributes {dimension_semantics = [#tpu.dimension_semantics<parallel>], iteration_bounds = array<i64: 2>, scalar_prefetch = 0 : i64, scratch_operands = 1 : i64, tpu.core_type = #tpu.core_type<tc>, window_params = [{transform_indices = @transform_0, window_bounds = array<i64: 1, 64, 128>}, {pipeline_mode = #tpu.pipeline_mode<synchronous>, transform_indices = @transform_1, window_bounds = array<i64: 128, 64>}, {pipeline_mode = #tpu.pipeline_mode<synchronous>, transform_indices = @transform_2, window_bounds = array<i64: 1, 64>}, {pipeline_mode = #tpu.pipeline_mode<synchronous>, transform_indices = @transform_3, window_bounds = array<i64: 64, 128>}, {pipeline_mode = #tpu.pipeline_mode<synchronous>, transform_indices = @transform_4, window_bounds = array<i64: 1, 128>}, {pipeline_mode = #tpu.pipeline_mode<synchronous>, transform_indices = @transform_5, window_bounds = array<i64: 9, 128>}, {pipeline_mode = #tpu.pipeline_mode<synchronous>, transform_indices = @transform_6, window_bounds = array<i64: 1, 128>}, {pipeline_mode = #tpu.pipeline_mode<synchronous>, transform_indices = @transform_7, window_bounds = array<i64: 128, 32>}, {pipeline_mode = #tpu.pipeline_mode<synchronous>, transform_indices = @transform_8, window_bounds = array<i64: 1, 32>}, {pipeline_mode = #tpu.pipeline_mode<synchronous>, transform_indices = @transform_9, window_bounds = array<i64: 32, 128>}, {pipeline_mode = #tpu.pipeline_mode<synchronous>, transform_indices = @transform_10, window_bounds = array<i64: 1, 128>}, {pipeline_mode = #tpu.pipeline_mode<synchronous>, transform_indices = @transform_11, window_bounds = array<i64: 128, 64>}, {pipeline_mode = #tpu.pipeline_mode<synchronous>, transform_indices = @transform_12, window_bounds = array<i64: 1, 64>}, {pipeline_mode = #tpu.pipeline_mode<synchronous>, transform_indices = @transform_13, window_bounds = array<i64: 64, 256>}, {pipeline_mode = #tpu.pipeline_mode<synchronous>, transform_indices = @transform_14, window_bounds = array<i64: 1, 256>}, {pipeline_mode = #tpu.pipeline_mode<synchronous>, transform_indices = @transform_15, window_bounds = array<i64: 256, 384>}, {pipeline_mode = #tpu.pipeline_mode<synchronous>, transform_indices = @transform_16, window_bounds = array<i64: 1, 384>}, {pipeline_mode = #tpu.pipeline_mode<synchronous>, transform_indices = @transform_17, window_bounds = array<i64: 384, 128>}, {pipeline_mode = #tpu.pipeline_mode<synchronous>, transform_indices = @transform_18, window_bounds = array<i64: 1, 128>}, {transform_indices = @transform_19, window_bounds = array<i64: 1, 1, 128>}]} {
    %c0 = arith.constant 0 : index
    %c0_0 = arith.constant 0 : index
    %c0_1 = arith.constant 0 : index
    %0 = vector.load %arg1[%c0, %c0_0, %c0_1] : memref<1x64x128xbf16, #tpu.memory_space<vmem>>, vector<1x64x128xbf16>
    %1 = vector.shape_cast %0 : vector<1x64x128xbf16> to vector<64x128xbf16>
    %c0_2 = arith.constant 0 : index
    %c0_3 = arith.constant 0 : index
    %2 = vector.load %arg2[%c0_2, %c0_3] : memref<128x64xbf16, #tpu.memory_space<vmem>>, vector<128x64xbf16>
    %cst = arith.constant dense<0.000000e+00> : vector<64x64xf32>
    %3 = tpu.matmul %1, %2, %cst {dimension_numbers = #tpu.dot_dimension_numbers<[1], [0], [0], [1], [0, 0, 1, 1], [], []>} : vector<64x128xbf16>, vector<128x64xbf16>, vector<64x64xf32> -> vector<64x64xf32>
    %c0_4 = arith.constant 0 : index
    %c0_5 = arith.constant 0 : index
    %4 = vector.load %arg3[%c0_4, %c0_5] : memref<1x64xf32, #tpu.memory_space<vmem>>, vector<1x64xf32>
    %5 = vector.broadcast %4 : vector<1x64xf32> to vector<64x64xf32>
    %6 = arith.addf %3, %5 : vector<64x64xf32>
    %cst_6 = arith.constant 3.000000e+00 : f32
    %7 = vector.broadcast %cst_6 : f32 to vector<64x64xf32>
    %8 = arith.addf %6, %7 : vector<64x64xf32>
    %cst_7 = arith.constant 0.000000e+00 : f32
    %cst_8 = arith.constant 6.000000e+00 : f32
    %9 = vector.broadcast %cst_7 : f32 to vector<64x64xf32>
    %10 = arith.maximumf %9, %8 : vector<64x64xf32>
    %11 = vector.broadcast %cst_8 : f32 to vector<64x64xf32>
    %12 = arith.minimumf %11, %10 : vector<64x64xf32>
    %13 = arith.mulf %6, %12 : vector<64x64xf32>
    %cst_9 = arith.constant 0.166666672 : f32
    %14 = vector.broadcast %cst_9 : f32 to vector<64x64xf32>
    %15 = arith.mulf %13, %14 : vector<64x64xf32>
    %16 = arith.truncf %15 : vector<64x64xf32> to vector<64x64xbf16>
    %c0_10 = arith.constant 0 : index
    %c0_11 = arith.constant 0 : index
    %17 = vector.load %arg4[%c0_10, %c0_11] : memref<64x128xbf16, #tpu.memory_space<vmem>>, vector<64x128xbf16>
    %cst_12 = arith.constant dense<0.000000e+00> : vector<64x128xf32>
    %18 = tpu.matmul %16, %17, %cst_12 {dimension_numbers = #tpu.dot_dimension_numbers<[1], [0], [0], [1], [0, 0, 1, 1], [], []>} : vector<64x64xbf16>, vector<64x128xbf16>, vector<64x128xf32> -> vector<64x128xf32>
    %c0_13 = arith.constant 0 : index
    %c0_14 = arith.constant 0 : index
    %19 = vector.load %arg5[%c0_13, %c0_14] : memref<1x128xf32, #tpu.memory_space<vmem>>, vector<1x128xf32>
    %20 = vector.broadcast %19 : vector<1x128xf32> to vector<64x128xf32>
    %21 = arith.addf %18, %20 : vector<64x128xf32>
    %cst_15 = arith.constant 3.000000e+00 : f32
    %22 = vector.broadcast %cst_15 : f32 to vector<64x128xf32>
    %23 = arith.addf %21, %22 : vector<64x128xf32>
    %cst_16 = arith.constant 0.000000e+00 : f32
    %cst_17 = arith.constant 6.000000e+00 : f32
    %24 = vector.broadcast %cst_16 : f32 to vector<64x128xf32>
    %25 = arith.maximumf %24, %23 : vector<64x128xf32>
    %26 = vector.broadcast %cst_17 : f32 to vector<64x128xf32>
    %27 = arith.minimumf %26, %25 : vector<64x128xf32>
    %28 = arith.mulf %21, %27 : vector<64x128xf32>
    %cst_18 = arith.constant 0.166666672 : f32
    %29 = vector.broadcast %cst_18 : f32 to vector<64x128xf32>
    %30 = arith.mulf %28, %29 : vector<64x128xf32>
    %cst_19 = arith.constant 0.000000e+00 : f32
    %31 = vector.broadcast %cst_19 : f32 to vector<1x10x128xf32>
    %c0_20 = arith.constant 0 : index
    %c0_21 = arith.constant 0 : index
    %c0_22 = arith.constant 0 : index
    %32 = vector.load %arg21[%c0_20, %c0_21, %c0_22] : memref<10x10x128xf32, #tpu.memory_space<vmem>>, vector<1x10x128xf32>
    tpu.vector_store %arg21[%c0_20, %c0_21, %c0_22], %31 {strides = array<i32>} : memref<10x10x128xf32, #tpu.memory_space<vmem>>, vector<1x10x128xf32>,
    %cst_23 = arith.constant 0.000000e+00 : f32
    %33 = vector.broadcast %cst_23 : f32 to vector<1x10x128xf32>
    %c9 = arith.constant 9 : index
    %c0_24 = arith.constant 0 : index
    %c0_25 = arith.constant 0 : index
    %34 = vector.load %arg21[%c9, %c0_24, %c0_25] : memref<10x10x128xf32, #tpu.memory_space<vmem>>, vector<1x10x128xf32>
    tpu.vector_store %arg21[%c9, %c0_24, %c0_25], %33 {strides = array<i32>} : memref<10x10x128xf32, #tpu.memory_space<vmem>>, vector<1x10x128xf32>,
    %cst_26 = arith.constant 0.000000e+00 : f32
    %35 = vector.broadcast %cst_26 : f32 to vector<10x1x128xf32>
    %c0_27 = arith.constant 0 : index
    %c0_28 = arith.constant 0 : index
    %c0_29 = arith.constant 0 : index
    %36 = vector.load %arg21[%c0_27, %c0_28, %c0_29] : memref<10x10x128xf32, #tpu.memory_space<vmem>>, vector<10x1x128xf32>
    tpu.vector_store %arg21[%c0_27, %c0_28, %c0_29], %35 {strides = array<i32>} : memref<10x10x128xf32, #tpu.memory_space<vmem>>, vector<10x1x128xf32>,
    %cst_30 = arith.constant 0.000000e+00 : f32
    %37 = vector.broadcast %cst_30 : f32 to vector<10x1x128xf32>
    %c0_31 = arith.constant 0 : index
    %c9_32 = arith.constant 9 : index
    %c0_33 = arith.constant 0 : index
    %38 = vector.load %arg21[%c0_31, %c9_32, %c0_33] : memref<10x10x128xf32, #tpu.memory_space<vmem>>, vector<10x1x128xf32>
    tpu.vector_store %arg21[%c0_31, %c9_32, %c0_33], %37 {strides = array<i32>} : memref<10x10x128xf32, #tpu.memory_space<vmem>>, vector<10x1x128xf32>,
    %39 = vector.shape_cast %30 : vector<64x128xf32> to vector<8x8x128xf32>
    %c1 = arith.constant 1 : index
    %c1_34 = arith.constant 1 : index
    %c0_35 = arith.constant 0 : index
    %40 = vector.load %arg21[%c1, %c1_34, %c0_35] : memref<10x10x128xf32, #tpu.memory_space<vmem>>, vector<8x8x128xf32>
    tpu.vector_store %arg21[%c1, %c1_34, %c0_35], %39 {strides = array<i32>} : memref<10x10x128xf32, #tpu.memory_space<vmem>>, vector<8x8x128xf32>,
    %cst_36 = arith.constant 0.000000e+00 : f32
    %41 = vector.broadcast %cst_36 : f32 to vector<8x8x128xf32>
    %c0_37 = arith.constant 0 : index
    %c0_38 = arith.constant 0 : index
    %c0_39 = arith.constant 0 : index
    %42 = vector.load %arg21[%c0_37, %c0_38, %c0_39] : memref<10x10x128xf32, #tpu.memory_space<vmem>>, vector<8x8x128xf32>
    %c0_40 = arith.constant 0 : index
    %c0_41 = arith.constant 0 : index
    %43 = vector.load %arg6[%c0_40, %c0_41] : memref<9x128xf32, #tpu.memory_space<vmem>>, vector<1x128xf32>
    %44 = vector.shape_cast %43 : vector<1x128xf32> to vector<1x1x128xf32>
    %45 = vector.broadcast %44 : vector<1x1x128xf32> to vector<8x8x128xf32>
    %46 = arith.mulf %42, %45 : vector<8x8x128xf32>
    %47 = arith.addf %41, %46 : vector<8x8x128xf32>
    %c0_42 = arith.constant 0 : index
    %c1_43 = arith.constant 1 : index
    %c0_44 = arith.constant 0 : index
    %48 = vector.load %arg21[%c0_42, %c1_43, %c0_44] : memref<10x10x128xf32, #tpu.memory_space<vmem>>, vector<8x8x128xf32>
    %c1_45 = arith.constant 1 : index
    %c0_46 = arith.constant 0 : index
    %49 = vector.load %arg6[%c1_45, %c0_46] : memref<9x128xf32, #tpu.memory_space<vmem>>, vector<1x128xf32>
    %50 = vector.shape_cast %49 : vector<1x128xf32> to vector<1x1x128xf32>
    %51 = vector.broadcast %50 : vector<1x1x128xf32> to vector<8x8x128xf32>
    %52 = arith.mulf %48, %51 : vector<8x8x128xf32>
    %53 = arith.addf %47, %52 : vector<8x8x128xf32>
    %c0_47 = arith.constant 0 : index
    %c2 = arith.constant 2 : index
    %c0_48 = arith.constant 0 : index
    %54 = vector.load %arg21[%c0_47, %c2, %c0_48] : memref<10x10x128xf32, #tpu.memory_space<vmem>>, vector<8x8x128xf32>
    %c2_49 = arith.constant 2 : index
    %c0_50 = arith.constant 0 : index
    %55 = vector.load %arg6[%c2_49, %c0_50] : memref<9x128xf32, #tpu.memory_space<vmem>>, vector<1x128xf32>
    %56 = vector.shape_cast %55 : vector<1x128xf32> to vector<1x1x128xf32>
    %57 = vector.broadcast %56 : vector<1x1x128xf32> to vector<8x8x128xf32>
    %58 = arith.mulf %54, %57 : vector<8x8x128xf32>
    %59 = arith.addf %53, %58 : vector<8x8x128xf32>
    %c1_51 = arith.constant 1 : index
    %c0_52 = arith.constant 0 : index
    %c0_53 = arith.constant 0 : index
    %60 = vector.load %arg21[%c1_51, %c0_52, %c0_53] : memref<10x10x128xf32, #tpu.memory_space<vmem>>, vector<8x8x128xf32>
    %c3 = arith.constant 3 : index
    %c0_54 = arith.constant 0 : index
    %61 = vector.load %arg6[%c3, %c0_54] : memref<9x128xf32, #tpu.memory_space<vmem>>, vector<1x128xf32>
    %62 = vector.shape_cast %61 : vector<1x128xf32> to vector<1x1x128xf32>
    %63 = vector.broadcast %62 : vector<1x1x128xf32> to vector<8x8x128xf32>
    %64 = arith.mulf %60, %63 : vector<8x8x128xf32>
    %65 = arith.addf %59, %64 : vector<8x8x128xf32>
    %c1_55 = arith.constant 1 : index
    %c1_56 = arith.constant 1 : index
    %c0_57 = arith.constant 0 : index
    %66 = vector.load %arg21[%c1_55, %c1_56, %c0_57] : memref<10x10x128xf32, #tpu.memory_space<vmem>>, vector<8x8x128xf32>
    %c4 = arith.constant 4 : index
    %c0_58 = arith.constant 0 : index
    %67 = vector.load %arg6[%c4, %c0_58] : memref<9x128xf32, #tpu.memory_space<vmem>>, vector<1x128xf32>
    %68 = vector.shape_cast %67 : vector<1x128xf32> to vector<1x1x128xf32>
    %69 = vector.broadcast %68 : vector<1x1x128xf32> to vector<8x8x128xf32>
    %70 = arith.mulf %66, %69 : vector<8x8x128xf32>
    %71 = arith.addf %65, %70 : vector<8x8x128xf32>
    %c1_59 = arith.constant 1 : index
    %c2_60 = arith.constant 2 : index
    %c0_61 = arith.constant 0 : index
    %72 = vector.load %arg21[%c1_59, %c2_60, %c0_61] : memref<10x10x128xf32, #tpu.memory_space<vmem>>, vector<8x8x128xf32>
    %c5 = arith.constant 5 : index
    %c0_62 = arith.constant 0 : index
    %73 = vector.load %arg6[%c5, %c0_62] : memref<9x128xf32, #tpu.memory_space<vmem>>, vector<1x128xf32>
    %74 = vector.shape_cast %73 : vector<1x128xf32> to vector<1x1x128xf32>
    %75 = vector.broadcast %74 : vector<1x1x128xf32> to vector<8x8x128xf32>
    %76 = arith.mulf %72, %75 : vector<8x8x128xf32>
    %77 = arith.addf %71, %76 : vector<8x8x128xf32>
    %c2_63 = arith.constant 2 : index
    %c0_64 = arith.constant 0 : index
    %c0_65 = arith.constant 0 : index
    %78 = vector.load %arg21[%c2_63, %c0_64, %c0_65] : memref<10x10x128xf32, #tpu.memory_space<vmem>>, vector<8x8x128xf32>
    %c6 = arith.constant 6 : index
    %c0_66 = arith.constant 0 : index
    %79 = vector.load %arg6[%c6, %c0_66] : memref<9x128xf32, #tpu.memory_space<vmem>>, vector<1x128xf32>
    %80 = vector.shape_cast %79 : vector<1x128xf32> to vector<1x1x128xf32>
    %81 = vector.broadcast %80 : vector<1x1x128xf32> to vector<8x8x128xf32>
    %82 = arith.mulf %78, %81 : vector<8x8x128xf32>
    %83 = arith.addf %77, %82 : vector<8x8x128xf32>
    %c2_67 = arith.constant 2 : index
    %c1_68 = arith.constant 1 : index
    %c0_69 = arith.constant 0 : index
    %84 = vector.load %arg21[%c2_67, %c1_68, %c0_69] : memref<10x10x128xf32, #tpu.memory_space<vmem>>, vector<8x8x128xf32>
    %c7 = arith.constant 7 : index
    %c0_70 = arith.constant 0 : index
    %85 = vector.load %arg6[%c7, %c0_70] : memref<9x128xf32, #tpu.memory_space<vmem>>, vector<1x128xf32>
    %86 = vector.shape_cast %85 : vector<1x128xf32> to vector<1x1x128xf32>
    %87 = vector.broadcast %86 : vector<1x1x128xf32> to vector<8x8x128xf32>
    %88 = arith.mulf %84, %87 : vector<8x8x128xf32>
    %89 = arith.addf %83, %88 : vector<8x8x128xf32>
    %c2_71 = arith.constant 2 : index
    %c2_72 = arith.constant 2 : index
    %c0_73 = arith.constant 0 : index
    %90 = vector.load %arg21[%c2_71, %c2_72, %c0_73] : memref<10x10x128xf32, #tpu.memory_space<vmem>>, vector<8x8x128xf32>
    %c8 = arith.constant 8 : index
    %c0_74 = arith.constant 0 : index
    %91 = vector.load %arg6[%c8, %c0_74] : memref<9x128xf32, #tpu.memory_space<vmem>>, vector<1x128xf32>
    %92 = vector.shape_cast %91 : vector<1x128xf32> to vector<1x1x128xf32>
    %93 = vector.broadcast %92 : vector<1x1x128xf32> to vector<8x8x128xf32>
    %94 = arith.mulf %90, %93 : vector<8x8x128xf32>
    %95 = arith.addf %89, %94 : vector<8x8x128xf32>
    %c0_75 = arith.constant 0 : index
    %c0_76 = arith.constant 0 : index
    %96 = vector.load %arg7[%c0_75, %c0_76] : memref<1x128xf32, #tpu.memory_space<vmem>>, vector<1x128xf32>
    %97 = vector.shape_cast %96 : vector<1x128xf32> to vector<1x1x128xf32>
    %98 = vector.broadcast %97 : vector<1x1x128xf32> to vector<8x8x128xf32>
    %99 = arith.addf %95, %98 : vector<8x8x128xf32>
    %cst_77 = arith.constant 3.000000e+00 : f32
    %100 = vector.broadcast %cst_77 : f32 to vector<8x8x128xf32>
    %101 = arith.addf %99, %100 : vector<8x8x128xf32>
    %cst_78 = arith.constant 0.000000e+00 : f32
    %cst_79 = arith.constant 6.000000e+00 : f32
    %102 = vector.broadcast %cst_78 : f32 to vector<8x8x128xf32>
    %103 = arith.maximumf %102, %101 : vector<8x8x128xf32>
    %104 = vector.broadcast %cst_79 : f32 to vector<8x8x128xf32>
    %105 = arith.minimumf %104, %103 : vector<8x8x128xf32>
    %106 = arith.mulf %99, %105 : vector<8x8x128xf32>
    %cst_80 = arith.constant 0.166666672 : f32
    %107 = vector.broadcast %cst_80 : f32 to vector<8x8x128xf32>
    %108 = arith.mulf %106, %107 : vector<8x8x128xf32>
    %109 = vector.shape_cast %108 : vector<8x8x128xf32> to vector<64x128xf32>
    %cst_81 = arith.constant dense<0.000000e+00> : vector<128xf32>
    %110 = vector.multi_reduction <add>, %109, %cst_81 [0] : vector<64x128xf32> to vector<128xf32>
    %111 = vector.shape_cast %110 : vector<128xf32> to vector<1x128xf32>
    %cst_82 = arith.constant 6.400000e+01 : f32
    %112 = vector.broadcast %cst_82 : f32 to vector<1x128xf32>
    %113 = arith.divf %111, %112 : vector<1x128xf32>
    %114 = arith.truncf %113 : vector<1x128xf32> to vector<1x128xbf16>
    %c0_83 = arith.constant 0 : index
    %c0_84 = arith.constant 0 : index
    %115 = vector.load %arg8[%c0_83, %c0_84] : memref<128x32xbf16, #tpu.memory_space<vmem>>, vector<128x32xbf16>
    %cst_85 = arith.constant dense<0.000000e+00> : vector<1x32xf32>
    %116 = tpu.matmul %114, %115, %cst_85 {dimension_numbers = #tpu.dot_dimension_numbers<[1], [0], [0], [1], [0, 0, 1, 1], [], []>} : vector<1x128xbf16>, vector<128x32xbf16>, vector<1x32xf32> -> vector<1x32xf32>
    %c0_86 = arith.constant 0 : index
    %c0_87 = arith.constant 0 : index
    %117 = vector.load %arg9[%c0_86, %c0_87] : memref<1x32xf32, #tpu.memory_space<vmem>>, vector<1x32xf32>
    %118 = arith.addf %116, %117 : vector<1x32xf32>
    %cst_88 = arith.constant 0.000000e+00 : f32
    %119 = vector.broadcast %cst_88 : f32 to vector<1x32xf32>
    %120 = arith.maximumf %118, %119 : vector<1x32xf32>
    %121 = arith.truncf %120 : vector<1x32xf32> to vector<1x32xbf16>
    %c0_89 = arith.constant 0 : index
    %c0_90 = arith.constant 0 : index
    %122 = vector.load %arg10[%c0_89, %c0_90] : memref<32x128xbf16, #tpu.memory_space<vmem>>, vector<32x128xbf16>
    %cst_91 = arith.constant dense<0.000000e+00> : vector<1x128xf32>
    %123 = tpu.matmul %121, %122, %cst_91 {dimension_numbers = #tpu.dot_dimension_numbers<[1], [0], [0], [1], [0, 0, 1, 1], [], []>} : vector<1x32xbf16>, vector<32x128xbf16>, vector<1x128xf32> -> vector<1x128xf32>
    %c0_92 = arith.constant 0 : index
    %c0_93 = arith.constant 0 : index
    %124 = vector.load %arg11[%c0_92, %c0_93] : memref<1x128xf32, #tpu.memory_space<vmem>>, vector<1x128xf32>
    %125 = arith.addf %123, %124 : vector<1x128xf32>
    %cst_94 = arith.constant 3.000000e+00 : f32
    %126 = vector.broadcast %cst_94 : f32 to vector<1x128xf32>
    %127 = arith.addf %125, %126 : vector<1x128xf32>
    %cst_95 = arith.constant 0.000000e+00 : f32
    %cst_96 = arith.constant 6.000000e+00 : f32
    %128 = vector.broadcast %cst_95 : f32 to vector<1x128xf32>
    %129 = arith.maximumf %128, %127 : vector<1x128xf32>
    %130 = vector.broadcast %cst_96 : f32 to vector<1x128xf32>
    %131 = arith.minimumf %130, %129 : vector<1x128xf32>
    %cst_97 = arith.constant 0.166666672 : f32
    %132 = vector.broadcast %cst_97 : f32 to vector<1x128xf32>
    %133 = arith.mulf %131, %132 : vector<1x128xf32>
    %134 = vector.broadcast %133 : vector<1x128xf32> to vector<64x128xf32>
    %135 = arith.mulf %109, %134 : vector<64x128xf32>
    %136 = arith.truncf %135 : vector<64x128xf32> to vector<64x128xbf16>
    %c0_98 = arith.constant 0 : index
    %c0_99 = arith.constant 0 : index
    %137 = vector.load %arg12[%c0_98, %c0_99] : memref<128x64xbf16, #tpu.memory_space<vmem>>, vector<128x64xbf16>
    %cst_100 = arith.constant dense<0.000000e+00> : vector<64x64xf32>
    %138 = tpu.matmul %136, %137, %cst_100 {dimension_numbers = #tpu.dot_dimension_numbers<[1], [0], [0], [1], [0, 0, 1, 1], [], []>} : vector<64x128xbf16>, vector<128x64xbf16>, vector<64x64xf32> -> vector<64x64xf32>
    %c0_101 = arith.constant 0 : index
    %c0_102 = arith.constant 0 : index
    %139 = vector.load %arg13[%c0_101, %c0_102] : memref<1x64xf32, #tpu.memory_space<vmem>>, vector<1x64xf32>
    %140 = vector.broadcast %139 : vector<1x64xf32> to vector<64x64xf32>
    %141 = arith.addf %138, %140 : vector<64x64xf32>
    %142 = arith.addf %141, %15 : vector<64x64xf32>
    %143 = arith.truncf %142 : vector<64x64xf32> to vector<64x64xbf16>
    %c0_103 = arith.constant 0 : index
    %c0_104 = arith.constant 0 : index
    %144 = vector.load %arg14[%c0_103, %c0_104] : memref<64x256xbf16, #tpu.memory_space<vmem>>, vector<64x256xbf16>
    %cst_105 = arith.constant dense<0.000000e+00> : vector<64x256xf32>
    %145 = tpu.matmul %143, %144, %cst_105 {dimension_numbers = #tpu.dot_dimension_numbers<[1], [0], [0], [1], [0, 0, 1, 1], [], []>} : vector<64x64xbf16>, vector<64x256xbf16>, vector<64x256xf32> -> vector<64x256xf32>
    %c0_106 = arith.constant 0 : index
    %c0_107 = arith.constant 0 : index
    %146 = vector.load %arg15[%c0_106, %c0_107] : memref<1x256xf32, #tpu.memory_space<vmem>>, vector<1x256xf32>
    %147 = vector.broadcast %146 : vector<1x256xf32> to vector<64x256xf32>
    %148 = arith.addf %145, %147 : vector<64x256xf32>
    %cst_108 = arith.constant 3.000000e+00 : f32
    %149 = vector.broadcast %cst_108 : f32 to vector<64x256xf32>
    %150 = arith.addf %148, %149 : vector<64x256xf32>
    %cst_109 = arith.constant 0.000000e+00 : f32
    %cst_110 = arith.constant 6.000000e+00 : f32
    %151 = vector.broadcast %cst_109 : f32 to vector<64x256xf32>
    %152 = arith.maximumf %151, %150 : vector<64x256xf32>
    %153 = vector.broadcast %cst_110 : f32 to vector<64x256xf32>
    %154 = arith.minimumf %153, %152 : vector<64x256xf32>
    %155 = arith.mulf %148, %154 : vector<64x256xf32>
    %cst_111 = arith.constant 0.166666672 : f32
    %156 = vector.broadcast %cst_111 : f32 to vector<64x256xf32>
    %157 = arith.mulf %155, %156 : vector<64x256xf32>
    %cst_112 = arith.constant dense<0.000000e+00> : vector<256xf32>
    %158 = vector.multi_reduction <add>, %157, %cst_112 [0] : vector<64x256xf32> to vector<256xf32>
    %159 = vector.shape_cast %158 : vector<256xf32> to vector<1x256xf32>
    %cst_113 = arith.constant 6.400000e+01 : f32
    %160 = vector.broadcast %cst_113 : f32 to vector<1x256xf32>
    %161 = arith.divf %159, %160 : vector<1x256xf32>
    %162 = arith.truncf %161 : vector<1x256xf32> to vector<1x256xbf16>
    %c0_114 = arith.constant 0 : index
    %c0_115 = arith.constant 0 : index
    %163 = vector.load %arg16[%c0_114, %c0_115] : memref<256x384xbf16, #tpu.memory_space<vmem>>, vector<256x384xbf16>
    %cst_116 = arith.constant dense<0.000000e+00> : vector<1x384xf32>
    %164 = tpu.matmul %162, %163, %cst_116 {dimension_numbers = #tpu.dot_dimension_numbers<[1], [0], [0], [1], [0, 0, 1, 1], [], []>} : vector<1x256xbf16>, vector<256x384xbf16>, vector<1x384xf32> -> vector<1x384xf32>
    %c0_117 = arith.constant 0 : index
    %c0_118 = arith.constant 0 : index
    %165 = vector.load %arg17[%c0_117, %c0_118] : memref<1x384xf32, #tpu.memory_space<vmem>>, vector<1x384xf32>
    %166 = arith.addf %164, %165 : vector<1x384xf32>
    %cst_119 = arith.constant 3.000000e+00 : f32
    %167 = vector.broadcast %cst_119 : f32 to vector<1x384xf32>
    %168 = arith.addf %166, %167 : vector<1x384xf32>
    %cst_120 = arith.constant 0.000000e+00 : f32
    %cst_121 = arith.constant 6.000000e+00 : f32
    %169 = vector.broadcast %cst_120 : f32 to vector<1x384xf32>
    %170 = arith.maximumf %169, %168 : vector<1x384xf32>
    %171 = vector.broadcast %cst_121 : f32 to vector<1x384xf32>
    %172 = arith.minimumf %171, %170 : vector<1x384xf32>
    %173 = arith.mulf %166, %172 : vector<1x384xf32>
    %cst_122 = arith.constant 0.166666672 : f32
    %174 = vector.broadcast %cst_122 : f32 to vector<1x384xf32>
    %175 = arith.mulf %173, %174 : vector<1x384xf32>
    %176 = arith.truncf %175 : vector<1x384xf32> to vector<1x384xbf16>
    %c0_123 = arith.constant 0 : index
    %c0_124 = arith.constant 0 : index
    %177 = vector.load %arg18[%c0_123, %c0_124] : memref<384x128xbf16, #tpu.memory_space<vmem>>, vector<384x128xbf16>
    %cst_125 = arith.constant dense<0.000000e+00> : vector<1x128xf32>
    %178 = tpu.matmul %176, %177, %cst_125 {dimension_numbers = #tpu.dot_dimension_numbers<[1], [0], [0], [1], [0, 0, 1, 1], [], []>} : vector<1x384xbf16>, vector<384x128xbf16>, vector<1x128xf32> -> vector<1x128xf32>
    %c0_126 = arith.constant 0 : index
    %c0_127 = arith.constant 0 : index
    %179 = vector.load %arg19[%c0_126, %c0_127] : memref<1x128xf32, #tpu.memory_space<vmem>>, vector<1x128xf32>
    %180 = arith.addf %178, %179 : vector<1x128xf32>
    %c0_128 = arith.constant 0 : index
    %c0_129 = arith.constant 0 : index
    %c0_130 = arith.constant 0 : index
    %181 = vector.load %arg20[%c0_128, %c0_129, %c0_130] : memref<1x1x128xf32, #tpu.memory_space<vmem>>, vector<1x1x128xf32>
    %182 = vector.shape_cast %181 : vector<1x1x128xf32> to vector<1x128xf32>
    %183 = vector.shape_cast %180 : vector<1x128xf32> to vector<1x1x128xf32>
    tpu.vector_store %arg20[%c0_128, %c0_129, %c0_130], %183 {strides = array<i32>} : memref<1x1x128xf32, #tpu.memory_space<vmem>>, vector<1x1x128xf32>,
    return
  }
  func.func @transform_0(%arg0: i32) -> (i32, i32, i32) {
    %c0_i32 = arith.constant 0 : i32
    %c0_i32_0 = arith.constant 0 : i32
    %c0_i32_1 = arith.constant 0 : i32
    return %arg0, %c0_i32, %c0_i32_0 : i32, i32, i32
  }
  func.func @transform_1(%arg0: i32) -> (i32, i32) {
    %c0_i32 = arith.constant 0 : i32
    %c0_i32_0 = arith.constant 0 : i32
    %c0_i32_1 = arith.constant 0 : i32
    return %c0_i32, %c0_i32_0 : i32, i32
  }
  func.func @transform_2(%arg0: i32) -> (i32, i32) {
    %c0_i32 = arith.constant 0 : i32
    %c0_i32_0 = arith.constant 0 : i32
    %c0_i32_1 = arith.constant 0 : i32
    return %c0_i32, %c0_i32_0 : i32, i32
  }
  func.func @transform_3(%arg0: i32) -> (i32, i32) {
    %c0_i32 = arith.constant 0 : i32
    %c0_i32_0 = arith.constant 0 : i32
    %c0_i32_1 = arith.constant 0 : i32
    return %c0_i32, %c0_i32_0 : i32, i32
  }
  func.func @transform_4(%arg0: i32) -> (i32, i32) {
    %c0_i32 = arith.constant 0 : i32
    %c0_i32_0 = arith.constant 0 : i32
    %c0_i32_1 = arith.constant 0 : i32
    return %c0_i32, %c0_i32_0 : i32, i32
  }
  func.func @transform_5(%arg0: i32) -> (i32, i32) {
    %c0_i32 = arith.constant 0 : i32
    %c0_i32_0 = arith.constant 0 : i32
    %c0_i32_1 = arith.constant 0 : i32
    return %c0_i32, %c0_i32_0 : i32, i32
  }
  func.func @transform_6(%arg0: i32) -> (i32, i32) {
    %c0_i32 = arith.constant 0 : i32
    %c0_i32_0 = arith.constant 0 : i32
    %c0_i32_1 = arith.constant 0 : i32
    return %c0_i32, %c0_i32_0 : i32, i32
  }
  func.func @transform_7(%arg0: i32) -> (i32, i32) {
    %c0_i32 = arith.constant 0 : i32
    %c0_i32_0 = arith.constant 0 : i32
    %c0_i32_1 = arith.constant 0 : i32
    return %c0_i32, %c0_i32_0 : i32, i32
  }
  func.func @transform_8(%arg0: i32) -> (i32, i32) {
    %c0_i32 = arith.constant 0 : i32
    %c0_i32_0 = arith.constant 0 : i32
    %c0_i32_1 = arith.constant 0 : i32
    return %c0_i32, %c0_i32_0 : i32, i32
  }
  func.func @transform_9(%arg0: i32) -> (i32, i32) {
    %c0_i32 = arith.constant 0 : i32
    %c0_i32_0 = arith.constant 0 : i32
    %c0_i32_1 = arith.constant 0 : i32
    return %c0_i32, %c0_i32_0 : i32, i32
  }
  func.func @transform_10(%arg0: i32) -> (i32, i32) {
    %c0_i32 = arith.constant 0 : i32
    %c0_i32_0 = arith.constant 0 : i32
    %c0_i32_1 = arith.constant 0 : i32
    return %c0_i32, %c0_i32_0 : i32, i32
  }
  func.func @transform_11(%arg0: i32) -> (i32, i32) {
    %c0_i32 = arith.constant 0 : i32
    %c0_i32_0 = arith.constant 0 : i32
    %c0_i32_1 = arith.constant 0 : i32
    return %c0_i32, %c0_i32_0 : i32, i32
  }
  func.func @transform_12(%arg0: i32) -> (i32, i32) {
    %c0_i32 = arith.constant 0 : i32
    %c0_i32_0 = arith.constant 0 : i32
    %c0_i32_1 = arith.constant 0 : i32
    return %c0_i32, %c0_i32_0 : i32, i32
  }
  func.func @transform_13(%arg0: i32) -> (i32, i32) {
    %c0_i32 = arith.constant 0 : i32
    %c0_i32_0 = arith.constant 0 : i32
    %c0_i32_1 = arith.constant 0 : i32
    return %c0_i32, %c0_i32_0 : i32, i32
  }
  func.func @transform_14(%arg0: i32) -> (i32, i32) {
    %c0_i32 = arith.constant 0 : i32
    %c0_i32_0 = arith.constant 0 : i32
    %c0_i32_1 = arith.constant 0 : i32
    return %c0_i32, %c0_i32_0 : i32, i32
  }
  func.func @transform_15(%arg0: i32) -> (i32, i32) {
    %c0_i32 = arith.constant 0 : i32
    %c0_i32_0 = arith.constant 0 : i32
    %c0_i32_1 = arith.constant 0 : i32
    return %c0_i32, %c0_i32_0 : i32, i32
  }
  func.func @transform_16(%arg0: i32) -> (i32, i32) {
    %c0_i32 = arith.constant 0 : i32
    %c0_i32_0 = arith.constant 0 : i32
    %c0_i32_1 = arith.constant 0 : i32
    return %c0_i32, %c0_i32_0 : i32, i32
  }
  func.func @transform_17(%arg0: i32) -> (i32, i32) {
    %c0_i32 = arith.constant 0 : i32
    %c0_i32_0 = arith.constant 0 : i32
    %c0_i32_1 = arith.constant 0 : i32
    return %c0_i32, %c0_i32_0 : i32, i32
  }
  func.func @transform_18(%arg0: i32) -> (i32, i32) {
    %c0_i32 = arith.constant 0 : i32
    %c0_i32_0 = arith.constant 0 : i32
    %c0_i32_1 = arith.constant 0 : i32
    return %c0_i32, %c0_i32_0 : i32, i32
  }
  func.func @transform_19(%arg0: i32) -> (i32, i32, i32) {
    %c0_i32 = arith.constant 0 : i32
    %c0_i32_0 = arith.constant 0 : i32
    %c0_i32_1 = arith.constant 0 : i32
    return %arg0, %c0_i32, %c0_i32_0 : i32, i32, i32
  }
}

</mosaic_0001>

<bundles_post_ra>
// kernel: tile.64
= control target key start
LH: loop header
LB: loop body
LE: loop exit
PB: predicated region body
PF: predicated region fallthrough
CT: control target
= control target key end

     0   :  { %vm40_vm0 = vcmask 1047556   ;;  %s116_s24 = smov 64   ;;  %s117_s25 = smov 32   ;;  %vm42_vm1 = vcmask 261120   ;;  %vm57_vm2 = vcmask 1048320   ;;  %vm74_vm3 = vcmask 785920   ;;  %s183_s0 = inlined_call_operand.vmem [shape: f32[9,4,32], index: 0, kind: input, shape index: {}]   ;;  %s184_s1 = inlined_call_operand.vmem [shape: f32[9,128], index: 1, kind: output, shape index: {}]  }
   0x1   :  { %v101_v0 = vld [vmem:[%s183_s0 + $0x1c] sm:$0xf]  ;;  %v102_v1 = vld [vmem:[%s183_s0 + $0x18] sm:$0xf]  ;;  %v103_v2 = vld [vmem:[%s183_s0 + $0x14] sm:$0xf] }
   0x2   :  { %11 = vst [vmem:[#allocation0 + $0x38] sm:$0xf] %v101_v0  ;;  %v104_v3 = vld [vmem:[%s183_s0 + $0x10] sm:$0xf]  ;;  %v105_v4 = vld [vmem:[%s183_s0 + $0xc] sm:$0xf] }
   0x3   :  { %15 = vst [vmem:[#allocation0 + $0x30] sm:$0xf] %v102_v1  ;;  %v106_v5 = vld [vmem:[%s183_s0 + $0x8] sm:$0xf]  ;;  %v107_v6 = vld [vmem:[%s183_s0 + $0x4] sm:$0xf] }
   0x4   :  { %19 = vst [vmem:[#allocation0 + $0x28] sm:$0xf] %v103_v2  ;;  %v36_v7 = vld [vmem:[%s183_s0] sm:$0xf]  ;;  %vm91_vm4 = vcmask 523520  }
   0x5   :  { %23 = vst [vmem:[#allocation0 + $0x20] sm:$0xf] %v104_v3  ;;  %v100_v8 = vld [vmem:[%s183_s0 + $0x20] sm:$0xf]  ;;  %s115_s0 = smov 96  }
   0x6   :  { %27 = vst [vmem:[#allocation0 + $0x18] sm:$0xf] %v105_v4 }
   0x7   :  { %31 = vst [vmem:[#allocation0 + $0x10] sm:$0xf] %v106_v5 }
   0x8   :  { %35 = vst [vmem:[#allocation0 + $0x8] sm:$0xf] %v107_v6 }
   0x9   :  { %37 = vst [vmem:[#allocation0] sm:$0xf] %v36_v7 }
   0xa   :  { %7 = vst [vmem:[#allocation0 + $0x40] sm:$0xf] %v100_v8 }
   0xc   :  { %v52_v9 = vld [vmem:[#allocation0 + $0x3] ss:$8 sm:$0xf0]   ;;  %v69_v10 = vld [vmem:[#allocation0 + $0x2] ss:$8 sm:$0xf0]  }
   0xd   :  { %v86_v11 = vld [vmem:[#allocation0 + $0x1] ss:$8 sm:$0xf0]   ;;  %v39_v22 = vld [vmem:[#allocation0] ss:$8 sm:$0xf0]  }
  0x10   :  { %v50_v12 = vld [vmem:[#allocation0 + $0x3] ss:$8 sm:$0xf]   ;;  %v67_v13 = vld [vmem:[#allocation0 + $0x2] ss:$8 sm:$0xf]  }
  0x11   :  { %v54_v14 = vsel %vm40_vm0, %v52_v9, %v50_v12  ;;  %v71_v15 = vsel %vm40_vm0, %v69_v10, %v67_v13  ;;  %v84_v16 = vld [vmem:[#allocation0 + $0x1] ss:$8 sm:$0xf]   ;;  %v60_v18 = vld [vmem:[#allocation0 + $0x43] sm:$0x1]  }
  0x12   :  { %55 = vrot.lane.b32.xlu0 %v54_v14, %s115_s0  ;;  %72 = vrot.lane.b32.xlu1 %v71_v15, %s116_s24  ;;  %v88_v17 = vsel %vm40_vm0, %v86_v11, %v84_v16  ;;  %v77_v19 = vld [vmem:[#allocation0 + $0x42] sm:$0x1]   ;;  %v94_v20 = vld [vmem:[#allocation0 + $0x41] sm:$0x1]   ;;  %v45_v24 = vld [vmem:[#allocation0 + $0x40] sm:$0x1]  }
  0x13   :  { %89 = vrot.lane.b32.xlu2 %v88_v17, %s117_s25  ;;  %v38_v21 = vld [vmem:[#allocation0] ss:$8 sm:$0xf]   ;;  %108 = vst.msk [vmem:[%s184_s1 + $0x8] sm:$0x1] %vm42_vm1, %v45_v24  }
  0x14   :  { %v41_v23 = vsel %vm40_vm0, %v39_v22, %v38_v21 }
  0x15   :  { %43 = vst.msk [vmem:[%s184_s1] sm:$0xff] %vm42_vm1, %v41_v23  }
  0x1a   :  { %61 = vrot.lane.b32.xlu0 %v60_v18, %s115_s0  ;;  %78 = vrot.lane.b32.xlu1 %v77_v19, %s116_s24 }
  0x1b   :  { %95 = vrot.lane.b32.xlu2 %v94_v20, %s117_s25 }
  0x6d   :  { %v90_v25 = vpop.permute.xlu2 %89  }
  0x75   :  { %v96_v26 = vpop.permute.xlu2 %95  }
  0x84   :  { %v56_v27 = vpop.permute.xlu0 %55   ;;  %v73_v28 = vpop.permute.xlu1 %72  }
  0x85   :  { %58 = vst.msk [vmem:[%s184_s1] sm:$0xff] %vm57_vm2, %v56_v27  }
  0x86   :  { %75 = vst.msk [vmem:[%s184_s1] sm:$0xff] %vm74_vm3, %v73_v28  }
  0x87   :  { %92 = vst.msk [vmem:[%s184_s1] sm:$0xff] %vm91_vm4, %v90_v25  }
  0x8c   :  { %v62_v29 = vpop.permute.xlu0 %61   ;;  %v79_v30 = vpop.permute.xlu1 %78  }
  0x8d   :  { %109 = vst.msk [vmem:[%s184_s1 + $0x8] sm:$0x1] %vm57_vm2, %v62_v29  }
  0x8e   :  { %110 = vst.msk [vmem:[%s184_s1 + $0x8] sm:$0x1] %vm74_vm3, %v79_v30  }
  0x8f   :  { %111 = vst.msk [vmem:[%s184_s1 + $0x8] sm:$0x1] %vm91_vm4, %v96_v26  }

// kernel: mobilenetv3_regular_forward.1
= control target key start
LH: loop header
LB: loop body
LE: loop exit
PB: predicated region body
PF: predicated region fallthrough
CT: control target
= control target key end

     0   :  { %s4033_s0 = inlined_call_operand.vmem [shape: bf16[2,64,128], index: 0, kind: input, shape index: {}]   ;;  %s4034_s1 = inlined_call_operand.vmem [shape: bf16[128,64], index: 1, kind: input, shape index: {}]   ;;  %s4035_s2 = inlined_call_operand.vmem [shape: f32[1,64], index: 2, kind: input, shape index: {}]   ;;  %s4036_s3 = inlined_call_operand.vmem [shape: bf16[64,128], index: 3, kind: input, shape index: {}]   ;;  %s4037_s4 = inlined_call_operand.vmem [shape: f32[1,128], index: 4, kind: input, shape index: {}]   ;;  %s4038_s5 = inlined_call_operand.vmem [shape: f32[9,128], index: 5, kind: input, shape index: {}]   ;;  %s4039_s6 = inlined_call_operand.vmem [shape: f32[1,128], index: 6, kind: input, shape index: {}]   ;;  %s4040_s7 = inlined_call_operand.vmem [shape: bf16[128,32], index: 7, kind: input, shape index: {}]   ;;  %s4041_s8 = inlined_call_operand.vmem [shape: f32[1,32], index: 8, kind: input, shape index: {}]   ;;  %s4042_s9 = inlined_call_operand.vmem [shape: bf16[32,128], index: 9, kind: input, shape index: {}]   ;;  %s4043_s10 = inlined_call_operand.vmem [shape: f32[1,128], index: 10, kind: input, shape index: {}]   ;;  %s4044_s11 = inlined_call_operand.vmem [shape: bf16[128,64], index: 11, kind: input, shape index: {}]   ;;  %s4045_s12 = inlined_call_operand.vmem [shape: f32[1,64], index: 12, kind: input, shape index: {}]   ;;  %s4046_s13 = inlined_call_operand.vmem [shape: bf16[64,256], index: 13, kind: input, shape index: {}]   ;;  %s4047_s14 = inlined_call_operand.vmem [shape: f32[1,256], index: 14, kind: input, shape index: {}]   ;;  %s4048_s15 = inlined_call_operand.vmem [shape: bf16[256,384], index: 15, kind: input, shape index: {}]   ;;  %s4049_s16 = inlined_call_operand.vmem [shape: f32[1,384], index: 16, kind: input, shape index: {}]   ;;  %s4050_s17 = inlined_call_operand.vmem [shape: bf16[384,128], index: 17, kind: input, shape index: {}]   ;;  %s4051_s18 = inlined_call_operand.vmem [shape: f32[1,128], index: 18, kind: input, shape index: {}]   ;;  %s4052_s19 = inlined_call_operand.vmem [shape: f32[2,1,128], index: 19, kind: output, shape index: {}]  }
   0x1   :  { %4055 = sst [smem:[#allocation3_spill]] %s4033_s0  ;;  %s3140_s0 = smov 0  }
   0x2   :  { %4056 = sst [smem:[#allocation4_spill]] %s4034_s1 }
   0x3   :  { %4057 = sst [smem:[#allocation5_spill]] %s4035_s2 }
   0x4   :  { %4058 = sst [smem:[#allocation6_spill]] %s4036_s3 }
   0x5 LB: > { %s2412_s30 = sadd.s32 4294967295, %s3036_s0   ;;  %p2416_p0 = scmp.ge.s32.totalorder %s3036_s0, 1  ;;  %s3036_s0 = sphi %s3140_s0, %s29_s0  }
   0x6   : > { %p537_p1 = scmp.lt.s32.totalorder %s3036_s0, 3 }
   0x8   : > { %p538_p2 = pnand %p2416_p0, %p537_p1 }
   0x9   : > { %s4059_s1 = sld [smem:[#allocation4_spill]] (!%p538_p2)  ;;  %p591_p3 = scmp.lt.s32.totalorder (!%p538_p2), %s2412_s30, 1 }
   0xa   : > { %541 = sbr.rel (%p538_p2) target bundleno = 1383 (0x567), region = 96  ;;  %s4060_s3 = sld [smem:[#allocation3_spill]] (!%p538_p2) }
   0xb   : > { %s4061_s29 = sld [smem:[#allocation6_spill]] (!%p538_p2) }
   0xf   : > { %v2902_v0 = vld [vmem:[%s4059_s1 + $0x38] sm:$0xff]  ;;  %v2901_v1 = vld [vmem:[%s4059_s1 + $0x30] sm:$0xff]  ;;  %v2900_v2 = vld [vmem:[%s4059_s1 + $0x28] sm:$0xff]  ;;  %s4064_s30 = smov (!%p591_p3, %s2412_s30), 1  ;;  %vm809_vm0 = vcmask 523264   ;;  %vm1331_vm2 = vcmask 261120  }
  0x10   : > { %700 = vmatpush.bf16.msra.mxu0 %v2902_v0  ;;  %v2899_v3 = vld [vmem:[%s4059_s1 + $0x20] sm:$0xff]  ;;  %v2898_v4 = vld [vmem:[%s4059_s1 + $0x18] sm:$0xff]  ;;  %v2897_v5 = vld [vmem:[%s4059_s1 + $0x10] sm:$0xff]  ;;  %s2890_s22 = sshll.u32 %s4064_s30, 5  ;;  %s598_s21 = scalar_lea.vmem %s4052_s19, %s4064_s30 }
  0x11   : > { %v2896_v6 = vld [vmem:[%s4059_s1 + $0x8] sm:$0xff]  ;;  %v2895_v7 = vld [vmem:[%s4059_s1] sm:$0xff]  ;;  %s595_s26 = scalar_lea.vmem %s4060_s3, %s2890_s22  ;;  %v2906_v12 = vld [vmem:[%s4061_s29 + $0x18] sm:$0xff] }
  0x12   : > { %v2891_v8 = vld [vmem:[%s595_s26] sm:$0xff]  ;;  %v2892_v9 = vld [vmem:[%s595_s26 + $0x8] sm:$0xff]  ;;  %v2893_v10 = vld [vmem:[%s595_s26 + $0x10] sm:$0xff]  ;;  %826 = vmatpush.bf16.msra.mxu1 %v2906_v12 }
  0x13   : > { %v2894_v11 = vld [vmem:[%s595_s26 + $0x18] sm:$0xff]  ;;  %v2905_v13 = vld [vmem:[%s4061_s29 + $0x10] sm:$0xff]  ;;  %v2904_v14 = vld [vmem:[%s4061_s29 + $0x8] sm:$0xff]  ;;  %s4062_s26 = sld [smem:[#allocation5_spill]] }
  0x14   : > { %701 = vmatpush.bf16.msra.mxu0 %v2901_v1  ;;  %v2903_v15 = vld [vmem:[%s4061_s29] sm:$0xff] }
  0x16   : > { %827 = vmatpush.bf16.msra.mxu1 %v2905_v13  ;;  %v3038_v13 = vmov 0.0  }
  0x17   : > { %897 = vst [vmem:[#allocation2 + $0x10] sm:$0x1] %v3038_v13 }
  0x18   : > { %702 = vmatpush.bf16.msra.mxu0 %v2900_v2  ;;  %907 = vst [vmem:[#allocation2 + $0x19] sm:$0x1] %v3038_v13 }
  0x19   : > { %v3015_v16 = vld [vmem:[%s4062_s26] ss:$0 sm:$0xff]  ;;  %891 = vst [vmem:[#allocation2] sm:$0xff] %v3038_v13 }
  0x1a   : > { %828 = vmatpush.bf16.msra.mxu1 %v2904_v14  ;;  %892 = vst [vmem:[#allocation2 + $0x8] sm:$0x3] %v3038_v13  ;;  %v3224_v14 = vld [vmem:[%s4037_s4] ss:$0 sm:$0xff] }
  0x1b   : > { %894 = vst [vmem:[#allocation2 + $0x90] sm:$0xff] %v3038_v13 }
  0x1c   : > { %703 = vmatpush.bf16.msra.mxu0 %v2899_v3  ;;  %895 = vst [vmem:[#allocation2 + $0x98] sm:$0x3] %v3038_v13 }
  0x1d   : > { %898 = vst [vmem:[#allocation2 + $0x20] sm:$0x1] %v3038_v13 }
  0x1e   : > { %829 = vmatpush.bf16.msra.mxu1 %v2903_v15  ;;  %899 = vst [vmem:[#allocation2 + $0x30] sm:$0x1] %v3038_v13 }
  0x1f   : > { %900 = vst [vmem:[#allocation2 + $0x40] sm:$0x1] %v3038_v13 }
  0x20   : > { %704 = vmatpush.bf16.msra.mxu0 %v2898_v4  ;;  %901 = vst [vmem:[#allocation2 + $0x50] sm:$0x1] %v3038_v13 }
  0x21   : > { %902 = vst [vmem:[#allocation2 + $0x60] sm:$0x1] %v3038_v13 }
  0x22   : > { %903 = vst [vmem:[#allocation2 + $0x70] sm:$0x1] %v3038_v13 }
  0x23   : > { %904 = vst [vmem:[#allocation2 + $0x80] sm:$0x1] %v3038_v13 }
  0x24   : > { %705 = vmatpush.bf16.msra.mxu0 %v2897_v5  ;;  %908 = vst [vmem:[#allocation2 + $0x29] sm:$0x1] %v3038_v13 }
  0x25   : > { %909 = vst [vmem:[#allocation2 + $0x39] sm:$0x1] %v3038_v13 }
  0x26   : > { %910 = vst [vmem:[#allocation2 + $0x49] sm:$0x1] %v3038_v13 }
  0x27   : > { %911 = vst [vmem:[#allocation2 + $0x59] sm:$0x1] %v3038_v13 }
  0x28   : > { %706 = vmatpush.bf16.msra.mxu0 %v2896_v6  ;;  %912 = vst [vmem:[#allocation2 + $0x69] sm:$0x1] %v3038_v13 }
  0x29   : > { %913 = vst [vmem:[#allocation2 + $0x79] sm:$0x1] %v3038_v13 }
  0x2a   : > { %914 = vst [vmem:[#allocation2 + $0x89] sm:$0x1] %v3038_v13 }
  0x2b   : > { %896 = vst [vmem:[#allocation2] sm:$0x1] %v3038_v13 }
  0x2c   : > { %707 = vmatpush.bf16.msra.mxu0 %v2895_v7  ;;  %905 = vst [vmem:[#allocation2 + $0x90] sm:$0x1] %v3038_v13 }
  0x2d   : > { %906 = vst [vmem:[#allocation2 + $0x9] sm:$0x1] %v3038_v13 }
  0x2e   : > { %915 = vst [vmem:[#allocation2 + $0x99] sm:$0x1] %v3038_v13  ;;  %v2914_v13 = vld [vmem:[%s4040_s7 + $0x38] sm:$0xff] }
  0x2f   : > { %708 = vmatmul.bf16.vlgmr.msra.gmra.mxu0 %v2891_v8  ;;  %1299 = vmatpush.bf16.msra.mxu2 %v2914_v13  ;;  %v3335_v13 = vld [vmem:[%s4038_s5 + $0x7] ss:$0 sm:$0xff] }
  0x3f   : > { %713 = vmatmul.bf16.gmra.mxu0 %v2892_v9 }
  0x4f   : > { %718 = vmatmul.bf16.gmra.mxu0 %v2893_v10 }
  0x5f   : > { %723 = vmatmul.bf16.gmra.mxu0 %v2894_v11 }
  0xac   : > { %v709_v17 = vpop.f32.mrf.mxu0 }
  0xad   : > { %v710_v18 = vadd.f32 %v3015_v16, %v709_v17 }
  0xaf   : > { %v729_v19 = vadd.f32 3.0, %v710_v18 }
  0xb1   : > { %v737_v20 = vmax.f32 %v729_v19, 0.0 }
  0xb3   : > { %v745_v23 = vmin.f32 %v737_v20, 6.0 }
  0xb4   : > { %v711_v21 = vpop.f32.mrf.mxu0 }
  0xb5   : > { %v712_v22 = vadd.f32 %v3015_v16, %v711_v21  ;;  %v753_v26 = vmul.f32 %v745_v23, %v710_v18 }
  0xb7   : > { %v730_v24 = vadd.f32 3.0, %v712_v22  ;;  %v3193_v31 = vmul.f32 0.16666667, %v753_v26 }
  0xb9   : > { %v738_v25 = vmax.f32 %v730_v24, 0.0 }
  0xbb   : > { %v746_v27 = vmin.f32 %v738_v25, 6.0 }
  0xbc   : > { %v714_v28 = vpop.f32.mrf.mxu0 }
  0xbd   : > { %v754_v29 = vmul.f32 %v746_v27, %v712_v22  ;;  %v715_v30 = vadd.f32 %v3015_v16, %v714_v28 }
  0xbf   : > { %v3195_v32 = vmul.f32 0.16666667, %v754_v29  ;;  %v731_v33 = vadd.f32 3.0, %v715_v30 }
  0xc1   : > { %v769_v34 = vpack.c.bf16 %v3195_v32, %v3193_v31  ;;  %v739_v35 = vmax.f32 %v731_v33, 0.0 }
  0xc3   : > { %2483 = vmatmul.msk.bf16.vlgmr.msra.gmra.mxu1 %vm809_vm0, %v769_v34  ;;  %v747_v38 = vmin.f32 %v739_v35, 6.0  ;;  %v3238_v35 = vld [vmem:[%s4038_s5] ss:$0 sm:$0xff] }
  0xc4   : > { %v716_v36 = vpop.f32.mrf.mxu0 }
  0xc5   : > { %v717_v37 = vadd.f32 %v3015_v16, %v716_v36  ;;  %v755_v41 = vmul.f32 %v747_v38, %v715_v30 }
  0xc7   : > { %v732_v39 = vadd.f32 3.0, %v717_v37  ;;  %v3200_v46 = vmul.f32 0.16666667, %v755_v41  ;;  %v3244_v41 = vld [vmem:[%s4038_s5 + $0x1] ss:$0 sm:$0xff] }
  0xc9   : > { %v740_v40 = vmax.f32 %v732_v39, 0.0  ;;  %v925_v39 = vld [vmem:[#allocation2] sm:$0xff] }
  0xcb   : > { %v748_v42 = vmin.f32 %v740_v40, 6.0  ;;  %v951_v40 = vld [vmem:[#allocation2 + $0x1] sm:$0xff] }
  0xcc   : > { %v719_v43 = vpop.f32.mrf.mxu0 }
  0xcd   : > { %v756_v44 = vmul.f32 %v748_v42, %v717_v37  ;;  %v720_v45 = vadd.f32 %v3015_v16, %v719_v43 }
  0xcf   : > { %v3202_v47 = vmul.f32 0.16666667, %v756_v44  ;;  %v733_v48 = vadd.f32 3.0, %v720_v45  ;;  %v3249_v44 = vld [vmem:[%s4038_s5 + $0x2] ss:$0 sm:$0xff] }
  0xd1   : > { %v770_v49 = vpack.c.bf16 %v3202_v47, %v3200_v46  ;;  %v741_v50 = vmax.f32 %v733_v48, 0.0  ;;  %v935_v48 = vmul.f32 %v3238_v35, %v925_v39 }
  0xd3   : > { %2484 = vmatmul.msk.bf16.gmra.mxu1 %vm809_vm0, %v770_v49  ;;  %v749_v53 = vmin.f32 %v741_v50, 6.0  ;;  %v961_v49 = vmul.f32 %v3244_v41, %v951_v40 }
  0xd4   : > { %v721_v51 = vpop.f32.mrf.mxu0 }
  0xd5   : > { %v722_v52 = vadd.f32 %v3015_v16, %v721_v51  ;;  %v757_v56 = vmul.f32 %v749_v53, %v720_v45 }
  0xd7   : > { %v734_v54 = vadd.f32 3.0, %v722_v52  ;;  %v3207_v61 = vmul.f32 0.16666667, %v757_v56 }
  0xd9   : > { %v742_v55 = vmax.f32 %v734_v54, 0.0 }
  0xdb   : > { %v750_v57 = vmin.f32 %v742_v55, 6.0  ;;  %v3260_v55 = vld [vmem:[%s4038_s5 + $0x3] ss:$0 sm:$0xff] }
  0xdc   : > { %v724_v58 = vpop.f32.mrf.mxu0 }
  0xdd   : > { %v758_v59 = vmul.f32 %v750_v57, %v722_v52  ;;  %v725_v60 = vadd.f32 %v3015_v16, %v724_v58  ;;  %v977_v52 = vld [vmem:[#allocation2 + $0x2] sm:$0xff]  ;;  %v969_v58 = vadd.f32 %v961_v49, %v935_v48 }
  0xde   : > { %v2912_v49 = vld [vmem:[%s4040_s7 + $0x28] sm:$0xff] }
  0xdf   : > { %v3209_v62 = vmul.f32 0.16666667, %v758_v59  ;;  %v735_v63 = vadd.f32 3.0, %v725_v60  ;;  %v987_v59 = vmul.f32 %v3249_v44, %v977_v52 }
  0xe1   : > { %v771_v0 = vpack.c.bf16 %v3209_v62, %v3207_v61  ;;  %v743_v1 = vmax.f32 %v735_v63, 0.0 }
  0xe3   : > { %2485 = vmatmul.msk.bf16.gmra.mxu1 %vm809_vm0, %v771_v0  ;;  %v751_v4 = vmin.f32 %v743_v1, 6.0 }
  0xe4   : > { %v726_v2 = vpop.f32.mrf.mxu0 }
  0xe5   : > { %v727_v3 = vadd.f32 %v3015_v16, %v726_v2  ;;  %v759_v7 = vmul.f32 %v751_v4, %v725_v60 }
  0xe7   : > { %v736_v5 = vadd.f32 3.0, %v727_v3  ;;  %v3214_v10 = vmul.f32 0.16666667, %v759_v7  ;;  %v995_v7 = vadd.f32 %v987_v59, %v969_v58 }
  0xe9   : > { %v744_v6 = vmax.f32 %v736_v5, 0.0 }
  0xeb   : > { %v752_v8 = vmin.f32 %v744_v6, 6.0 }
  0xed   : > { %v760_v9 = vmul.f32 %v752_v8, %v727_v3 }
  0xef   : > { %v3216_v11 = vmul.f32 0.16666667, %v760_v9 }
  0xf1   : > { %v772_v12 = vpack.c.bf16 %v3216_v11, %v3214_v10 }
  0xf3   : > { %2486 = vmatmul.msk.bf16.gmra.mxu1 %vm809_vm0, %v772_v12 }
 0x140   : > { %v831_v15 = vpop.f32.mrf.mxu1 }
 0x141   : > { %v832_v16 = vadd.f32 %v3224_v14, %v831_v15 }
 0x143   : > { %v851_v17 = vadd.f32 3.0, %v832_v16 }
 0x145   : > { %v859_v18 = vmax.f32 %v851_v17, 0.0 }
 0x147   : > { %v867_v19 = vmin.f32 %v859_v18, 6.0 }
 0x148   : > { %v833_v20 = vpop.f32.mrf.mxu1 }
 0x149   : > { %v875_v21 = vmul.f32 %v867_v19, %v832_v16  ;;  %v834_v22 = vadd.f32 %v3224_v14, %v833_v20  ;;  %v3280_v16 = vld [vmem:[%s4038_s5 + $0x4] ss:$0 sm:$0xff] }
 0x14b   : > { %v3228_v23 = vmul.f32 0.16666667, %v875_v21  ;;  %v852_v24 = vadd.f32 3.0, %v834_v22 }
 0x14d   : > { %917 = vst [vmem:[#allocation2 + $0x11] sm:$0xff] %v3228_v23  ;;  %v860_v25 = vmax.f32 %v852_v24, 0.0  ;;  %v962_v0 = vmul.f32 %v3244_v41, %v3228_v23  ;;  %v1039_v39 = vmul.f32 %v3280_v16, %v3228_v23 }
 0x14f   : > { %v868_v26 = vmin.f32 %v860_v25, 6.0 }
 0x150   : > { %v836_v27 = vpop.f32.mrf.mxu1 }
 0x151   : > { %v876_v28 = vmul.f32 %v868_v26, %v834_v22  ;;  %v837_v29 = vadd.f32 %v3224_v14, %v836_v27  ;;  %v2913_v22 = vld [vmem:[%s4040_s7 + $0x30] sm:$0xff] }
 0x152   : > { %1300 = vmatpush.bf16.msra.mxu2 %v2913_v22 }
 0x153   : > { %v3232_v30 = vmul.f32 0.16666667, %v876_v28  ;;  %v853_v33 = vadd.f32 3.0, %v837_v29 }
 0x154   : > { %v926_v50 = vld [vmem:[#allocation2 + $0x10] sm:$0xff] }
 0x155   : > { %918 = vst [vmem:[#allocation2 + $0x21] sm:$0xff] %v3232_v30  ;;  %v861_v34 = vmax.f32 %v853_v33, 0.0  ;;  %v936_v54 = vmul.f32 %v3238_v35, %v926_v50  ;;  %v978_v1 = vld [vmem:[#allocation2 + $0x12] sm:$0xff]  ;;  %v1013_v6 = vmul.f32 %v3260_v55, %v926_v50  ;;  %v963_v8 = vmul.f32 %v3244_v41, %v3232_v30 }
 0x156   : > { %v988_v15 = vmul.f32 %v3249_v44, %v978_v1  ;;  %1301 = vmatpush.bf16.msra.mxu2 %v2912_v49 }
 0x157   : > { %v869_v36 = vmin.f32 %v861_v34, 6.0  ;;  %v970_v5 = vadd.f32 %v962_v0, %v936_v54  ;;  %v1021_v27 = vadd.f32 %v1013_v6, %v995_v7 }
 0x158   : > { %v838_v37 = vpop.f32.mrf.mxu1 }
 0x159   : > { %v839_v38 = vadd.f32 %v3224_v14, %v838_v37  ;;  %v877_v42 = vmul.f32 %v869_v36, %v837_v29  ;;  %v996_v24 = vadd.f32 %v988_v15, %v970_v5  ;;  %v3300_v37 = vld [vmem:[%s4038_s5 + $0x5] ss:$0 sm:$0xff]  ;;  %v1047_v54 = vadd.f32 %v1039_v39, %v1021_v27 }
 0x15a   : > { %v1065_v58 = vmul.f32 %v3300_v37, %v978_v1  ;;  %v2911_v5 = vld [vmem:[%s4040_s7 + $0x20] sm:$0xff] }
 0x15b   : > { %v854_v43 = vadd.f32 3.0, %v839_v38  ;;  %v3251_v45 = vmul.f32 0.16666667, %v877_v42  ;;  %1302 = vmatpush.bf16.msra.mxu2 %v2911_v5 }
 0x15c   : > { %v927_v56 = vld [vmem:[#allocation2 + $0x20] sm:$0xff] }
 0x15d   : > { %v862_v51 = vmax.f32 %v854_v43, 0.0  ;;  %919 = vst [vmem:[#allocation2 + $0x31] sm:$0xff] %v3251_v45  ;;  %v937_v2 = vmul.f32 %v3238_v35, %v927_v56  ;;  %v3282_v17 = vld [vmem:[#allocation2 + $0x22] sm:$0xff]  ;;  %v1014_v18 = vmul.f32 %v3260_v55, %v927_v56  ;;  %v964_v25 = vmul.f32 %v3244_v41, %v3251_v45 }
 0x15e   : > { %v989_v28 = vmul.f32 %v3249_v44, %v3282_v17  ;;  %v1041_v6 = vmul.f32 %v3280_v16, %v3251_v45 }
 0x15f   : > { %v870_v53 = vmin.f32 %v862_v51, 6.0  ;;  %v971_v20 = vadd.f32 %v963_v8, %v937_v2  ;;  %v1022_v42 = vadd.f32 %v1014_v18, %v996_v24  ;;  %v1040_v51 = vmul.f32 %v3280_v16, %v3232_v30 }
 0x160   : > { %v841_v57 = vpop.f32.mrf.mxu1  ;;  %v1066_v8 = vmul.f32 %v3300_v37, %v3282_v17 }
 0x161   : > { %v878_v60 = vmul.f32 %v870_v53, %v839_v38  ;;  %v842_v63 = vadd.f32 %v3224_v14, %v841_v57  ;;  %v3305_v38 = vld [vmem:[%s4038_s5 + $0x6] ss:$0 sm:$0xff]  ;;  %v997_v50 = vadd.f32 %v989_v28, %v971_v20  ;;  %v1048_v2 = vadd.f32 %v1040_v51, %v1022_v42 }
 0x162   : > { %v1092_v59 = vmul.f32 %v3305_v38, %v927_v56  ;;  %v1118_v42 = vmul.f32 %v3335_v13, %v3232_v30  ;;  %v3362_v30 = vld [vmem:[%s4038_s5 + $0x8] ss:$0 sm:$0xff] }
 0x163   : > { %v3267_v3 = vmul.f32 0.16666667, %v878_v60  ;;  %v855_v4 = vadd.f32 3.0, %v842_v63 }
 0x164   : > { %v928_v9 = vld [vmem:[#allocation2 + $0x30] sm:$0xff] }
 0x165   : > { %920 = vst [vmem:[#allocation2 + $0x41] sm:$0xff] %v3267_v3  ;;  %v863_v12 = vmax.f32 %v855_v4, 0.0  ;;  %v938_v19 = vmul.f32 %v3238_v35, %v928_v9  ;;  %v3293_v29 = vld [vmem:[#allocation2 + $0x32] sm:$0xff]  ;;  %v1015_v33 = vmul.f32 %v3260_v55, %v928_v9  ;;  %v965_v1 = vmul.f32 %v3244_v41, %v3267_v3 }
 0x166   : > { %v990_v52 = vmul.f32 %v3249_v44, %v3293_v29  ;;  %v1042_v24 = vmul.f32 %v3280_v16, %v3267_v3 }
 0x167   : > { %v871_v21 = vmin.f32 %v863_v12, 6.0  ;;  %v972_v40 = vadd.f32 %v964_v25, %v938_v19  ;;  %v1023_v57 = vadd.f32 %v1015_v33, %v997_v50  ;;  %v1073_v12 = vadd.f32 %v1065_v58, %v1047_v54  ;;  %v2910_v33 = vld [vmem:[%s4040_s7 + $0x18] sm:$0xff]  ;;  %v2909_v58 = vld [vmem:[%s4040_s7 + $0x10] sm:$0xff] }
 0x168   : > { %v843_v26 = vpop.f32.mrf.mxu1  ;;  %v1074_v25 = vadd.f32 %v1066_v8, %v1048_v2  ;;  %1303 = vmatpush.bf16.msra.mxu2 %v2910_v33 }
 0x169   : > { %v879_v34 = vmul.f32 %v871_v21, %v842_v63  ;;  %v844_v36 = vadd.f32 %v3224_v14, %v843_v26  ;;  %v998_v63 = vadd.f32 %v990_v52, %v972_v40  ;;  %v1049_v20 = vadd.f32 %v1041_v6, %v1023_v57 }
 0x16a   : > { %v1093_v21 = vmul.f32 %v3305_v38, %v928_v9  ;;  %v1100_v26 = vadd.f32 %v1092_v59, %v1073_v12 }
 0x16b   : > { %v3309_v43 = vmul.f32 0.16666667, %v879_v34  ;;  %v856_v48 = vadd.f32 3.0, %v844_v36  ;;  %v1067_v34 = vmul.f32 %v3300_v37, %v3293_v29 }
 0x16c   : > { %v929_v53 = vld [vmem:[#allocation2 + $0x40] sm:$0xff]  ;;  %v1101_v52 = vadd.f32 %v1093_v21, %v1074_v25  ;;  %v1144_v21 = vmul.f32 %v3362_v30, %v3282_v17  ;;  %1304 = vmatpush.bf16.msra.mxu2 %v2909_v58 }
 0x16d   : > { %921 = vst [vmem:[#allocation2 + $0x51] sm:$0xff] %v3309_v43  ;;  %v864_v23 = vmax.f32 %v856_v48, 0.0  ;;  %v939_v60 = vmul.f32 %v3238_v35, %v929_v53  ;;  %v1016_v0 = vmul.f32 %v3260_v55, %v929_v53  ;;  %v981_v15 = vld [vmem:[#allocation2 + $0x42] sm:$0xff]  ;;  %v1119_v48 = vmul.f32 %v3335_v13, %v3251_v45 }
 0x16e   : > { %v991_v39 = vmul.f32 %v3249_v44, %v981_v15  ;;  %v1075_v51 = vadd.f32 %v1067_v34, %v1049_v20  ;;  %v966_v59 = vmul.f32 %v3244_v41, %v3309_v43  ;;  %v1043_v5 = vmul.f32 %v3280_v16, %v3309_v43 }
 0x16f   : > { %v872_v4 = vmin.f32 %v864_v23, 6.0  ;;  %v1024_v56 = vadd.f32 %v1016_v0, %v998_v63  ;;  %v973_v22 = vadd.f32 %v965_v1, %v939_v60  ;;  %v1068_v23 = vmul.f32 %v3300_v37, %v981_v15 }
 0x170   : > { %v846_v7 = vpop.f32.mrf.mxu1  ;;  %v1126_v63 = vadd.f32 %v1118_v42, %v1100_v26  ;;  %v1120_v1 = vmul.f32 %v3335_v13, %v3267_v3  ;;  %v1127_v12 = vadd.f32 %v1119_v48, %v1101_v52  ;;  %v2908_v3 = vld [vmem:[%s4040_s7 + $0x8] sm:$0xff]  ;;  %v1121_v33 = vmul.f32 %v3335_v13, %v3309_v43 }
 0x171   : > { %v880_v18 = vmul.f32 %v872_v4, %v844_v36  ;;  %v847_v19 = vadd.f32 %v3224_v14, %v846_v7  ;;  %v1094_v36 = vmul.f32 %v3305_v38, %v929_v53  ;;  %v1050_v40 = vadd.f32 %v1042_v24, %v1024_v56  ;;  %1305 = vmatpush.bf16.msra.mxu2 %v2908_v3 }
 0x172   : > { %v999_v54 = vadd.f32 %v991_v39, %v973_v22  ;;  %v1145_v22 = vmul.f32 %v3362_v30, %v3293_v29  ;;  %v1146_v17 = vmul.f32 %v3362_v30, %v981_v15  ;;  %v1152_v34 = vadd.f32 %v1144_v21, %v1126_v63  ;;  %v2907_v15 = vld [vmem:[%s4040_s7] sm:$0xff] }
 0x173   : > { %v3341_v27 = vmul.f32 0.16666667, %v880_v18  ;;  %v857_v28 = vadd.f32 3.0, %v847_v19  ;;  %v1102_v60 = vadd.f32 %v1094_v36, %v1075_v51  ;;  %v1076_v6 = vadd.f32 %v1068_v23, %v1050_v40  ;;  %v3390_v40 = vld [vmem:[%s4039_s6] ss:$0 sm:$0xff] }
 0x174   : > { %v930_v9 = vld [vmem:[#allocation2 + $0x50] sm:$0xff]  ;;  %v1153_v39 = vadd.f32 %v1145_v22, %v1127_v12  ;;  %v3405_v63 = vadd.f32 %v3390_v40, %v1152_v34 }
 0x175   : > { %922 = vst [vmem:[#allocation2 + $0x61] sm:$0xff] %v3341_v27  ;;  %v865_v49 = vmax.f32 %v857_v28, 0.0  ;;  %v940_v50 = vmul.f32 %v3238_v35, %v930_v9  ;;  %v1017_v53 = vmul.f32 %v3260_v55, %v930_v9  ;;  %v1095_v57 = vmul.f32 %v3305_v38, %v930_v9  ;;  %v982_v2 = vld [vmem:[#allocation2 + $0x52] sm:$0xff]  ;;  %1306 = vmatpush.bf16.msra.mxu2 %v2907_v15 }
 0x176   : > { %v1069_v28 = vmul.f32 %v3300_v37, %v982_v2  ;;  %v967_v51 = vmul.f32 %v3244_v41, %v3341_v27  ;;  %v1147_v58 = vmul.f32 %v3362_v30, %v982_v2  ;;  %v1172_v22 = vadd.f32 3.0, %v3405_v63 }
 0x177   : > { %v873_v45 = vmin.f32 %v865_v49, 6.0  ;;  %v1025_v4 = vadd.f32 %v1017_v53, %v999_v54  ;;  %v974_v8 = vadd.f32 %v966_v59, %v940_v50  ;;  %v1103_v20 = vadd.f32 %v1095_v57, %v1076_v6 }
 0x178   : > { %v848_v0 = vpop.f32.mrf.mxu1  ;;  %v1044_v54 = vmul.f32 %v3280_v16, %v3341_v27 }
 0x179   : > { %v881_v7 = vmul.f32 %v873_v45, %v847_v19  ;;  %v849_v56 = vadd.f32 %v3224_v14, %v848_v0  ;;  %v1051_v18 = vadd.f32 %v1043_v5, %v1025_v4  ;;  %v992_v19 = vmul.f32 %v3249_v44, %v982_v2 }
 0x17a   : > { %v1128_v14 = vadd.f32 %v1120_v1, %v1102_v60  ;;  %v1129_v43 = vadd.f32 %v1121_v33, %v1103_v20  ;;  %v1122_v45 = vmul.f32 %v3335_v13, %v3341_v27  ;;  %v3408_v0 = vadd.f32 %v3390_v40, %v1153_v39 }
 0x17b   : > { %v889_v24 = vmul.f32 0.16666667, %v881_v7  ;;  %v858_v25 = vadd.f32 3.0, %v849_v56  ;;  %v1000_v9 = vadd.f32 %v992_v19, %v974_v8  ;;  %v1077_v48 = vadd.f32 %v1069_v28, %v1051_v18 }
 0x17c   : > { %v931_v26 = vld [vmem:[#allocation2 + $0x60] sm:$0xff]  ;;  %v1154_v53 = vadd.f32 %v1146_v17, %v1128_v14  ;;  %v1155_v1 = vadd.f32 %v1147_v58, %v1129_v43  ;;  %v1173_v14 = vadd.f32 3.0, %v3408_v0 }
 0x17d   : > { %923 = vst [vmem:[#allocation2 + $0x71] sm:$0xff] %v889_v24  ;;  %v866_v29 = vmax.f32 %v858_v25, 0.0  ;;  %v941_v36 = vmul.f32 %v3238_v35, %v931_v26  ;;  %v1018_v42 = vmul.f32 %v3260_v55, %v931_v26  ;;  %v1096_v49 = vmul.f32 %v3305_v38, %v931_v26  ;;  %v983_v52 = vld [vmem:[#allocation2 + $0x62] sm:$0xff] }
 0x17e   : > { %v1148_v6 = vmul.f32 %v3362_v30, %v983_v52  ;;  %v993_v8 = vmul.f32 %v3249_v44, %v983_v52  ;;  %v1070_v2 = vmul.f32 %v3300_v37, %v983_v52  ;;  %v1166_v12 = vadd.f32 %v3390_v40, %v1154_v53 }
 0x17f   : > { %v874_v50 = vmin.f32 %v866_v29, 6.0  ;;  %v1026_v23 = vadd.f32 %v1018_v42, %v1000_v9  ;;  %v1104_v57 = vadd.f32 %v1096_v49, %v1077_v48  ;;  %v975_v60 = vadd.f32 %v967_v51, %v941_v36 }
 0x180   : > { %v3419_v19 = vadd.f32 %v3390_v40, %v1155_v1  ;;  %v968_v26 = vmul.f32 %v3244_v41, %v889_v24  ;;  %v1045_v17 = vmul.f32 %v3280_v16, %v889_v24  ;;  %v1123_v34 = vmul.f32 %v3335_v13, %v889_v24 }
 0x181   : > { %v882_v59 = vmul.f32 %v874_v50, %v849_v56  ;;  %v1052_v4 = vadd.f32 %v1044_v54, %v1026_v23  ;;  %v1130_v5 = vadd.f32 %v1122_v45, %v1104_v57  ;;  %v1001_v20 = vadd.f32 %v993_v8, %v975_v60  ;;  %v1089_v45 = vld [vmem:[#allocation2 + $0x90] sm:$0xff] }
 0x182   : > { %v1174_v36 = vadd.f32 3.0, %v1166_v12  ;;  %v1180_v42 = vmax.f32 %v1172_v22, 0.0  ;;  %v1175_v43 = vadd.f32 3.0, %v3419_v19  ;;  %v1181_v50 = vmax.f32 %v1173_v14, 0.0 }
 0x183   : > { %v890_v7 = vmul.f32 0.16666667, %v882_v59  ;;  %v1156_v56 = vadd.f32 %v1148_v6, %v1130_v5  ;;  %v1078_v25 = vadd.f32 %v1070_v2, %v1052_v4 }
 0x184   : > { %v932_v27 = vld [vmem:[#allocation2 + $0x70] sm:$0xff]  ;;  %v1182_v24 = vmax.f32 %v1174_v36, 0.0  ;;  %v1183_v4 = vmax.f32 %v1175_v43, 0.0  ;;  %v1188_v5 = vmin.f32 %v1180_v42, 6.0  ;;  %v1189_v6 = vmin.f32 %v1181_v50, 6.0 }
 0x185   : > { %924 = vst [vmem:[#allocation2 + $0x81] sm:$0xff] %v890_v7  ;;  %v942_v18 = vmul.f32 %v3238_v35, %v932_v27  ;;  %v1019_v21 = vmul.f32 %v3260_v55, %v932_v27  ;;  %v1097_v3 = vmul.f32 %v3305_v38, %v932_v27  ;;  %v984_v28 = vld [vmem:[#allocation2 + $0x72] sm:$0xff]  ;;  %v1168_v29 = vadd.f32 %v3390_v40, %v1156_v56 }
 0x186   : > { %v1149_v49 = vmul.f32 %v3362_v30, %v984_v28  ;;  %v994_v41 = vmul.f32 %v3249_v44, %v984_v28  ;;  %v1071_v15 = vmul.f32 %v3300_v37, %v984_v28  ;;  %v1046_v1 = vmul.f32 %v3280_v16, %v890_v7  ;;  %v1115_v27 = vld [vmem:[#allocation2 + $0x91] sm:$0xff] }
 0x187   : > { %v1027_v33 = vadd.f32 %v1019_v21, %v1001_v20  ;;  %v1105_v35 = vadd.f32 %v1097_v3, %v1078_v25  ;;  %v976_v9 = vadd.f32 %v968_v26, %v942_v18  ;;  %v1176_v54 = vadd.f32 3.0, %v1168_v29  ;;  %v1141_v26 = vld [vmem:[#allocation2 + $0x92] sm:$0xff] }
 0x188   : > { %v1124_v2 = vmul.f32 %v3335_v13, %v890_v7  ;;  %v1099_v56 = vmul.f32 %v3305_v38, %v1089_v45  ;;  %v1190_v20 = vmin.f32 %v1182_v24, 6.0  ;;  %v1125_v14 = vmul.f32 %v3335_v13, %v1115_v27 }
 0x189   : > { %v1053_v39 = vadd.f32 %v1045_v17, %v1027_v33  ;;  %v1131_v48 = vadd.f32 %v1123_v34, %v1105_v35  ;;  %v1002_v53 = vadd.f32 %v994_v41, %v976_v9  ;;  %v1184_v18 = vmax.f32 %v1176_v54, 0.0 }
 0x18a   : > { %v1197_v16 = vmul.f32 %v1189_v6, %v3408_v0  ;;  %v1191_v7 = vmin.f32 %v1183_v4, 6.0  ;;  %v1198_v35 = vmul.f32 %v1190_v20, %v1166_v12  ;;  %v1151_v36 = vmul.f32 %v3362_v30, %v1141_v26 }
 0x18b   : > { %v1157_v52 = vadd.f32 %v1149_v49, %v1131_v48  ;;  %v1079_v57 = vadd.f32 %v1071_v15, %v1053_v39  ;;  %v1192_v9 = vmin.f32 %v1184_v18, 6.0  ;;  %v3039_v41 = vmov 64.0  }
 0x18c   : > { %v1010_v51 = vld [vmem:[#allocation2 + $0x80] sm:$0xff]  ;;  %v3443_v39 = vmul.f32 0.16666667, %v1197_v16  ;;  %v1199_v0 = vmul.f32 %v1191_v7, %v3419_v19  ;;  %v3448_v43 = vmul.f32 0.16666667, %v1198_v35  ;;  %3028 = vrcp.f32 %v3039_v41  ;;  %v2922_v7 = vld [vmem:[%s4044_s11 + $0x28] sm:$0xff] }
 0x18d   : > { %v1020_v23 = vmul.f32 %v3260_v55, %v1010_v51  ;;  %v1098_v58 = vmul.f32 %v3305_v38, %v1010_v51  ;;  %v1062_v59 = vld [vmem:[#allocation2 + $0x82] sm:$0xff]  ;;  %v1169_v60 = vadd.f32 %v3390_v40, %v1157_v52  ;;  %v1196_v38 = vmul.f32 %v1188_v5, %v3405_v63  ;;  %v1250_v35 = vld [vmem:[%s4041_s8] sm:$0x1] }
 0x18e   : > { %v1072_v22 = vmul.f32 %v3300_v37, %v1062_v59  ;;  %v1150_v3 = vmul.f32 %v3362_v30, %v1062_v59  ;;  %v1200_v12 = vmul.f32 %v1192_v9, %v1168_v29  ;;  %v2916_v30 = vld [vmem:[%s4042_s9 + $0x8] sm:$0xff]  ;;  %v3456_v54 = vmul.f32 0.16666667, %v1199_v0  ;;  %v2915_v29 = vld [vmem:[%s4042_s9] sm:$0xff] }
 0x18f   : > { %v1028_v44 = vadd.f32 %v1020_v23, %v1002_v53  ;;  %v1106_v8 = vadd.f32 %v1098_v58, %v1079_v57  ;;  %v1177_v55 = vadd.f32 3.0, %v1169_v60  ;;  %v3446_v49 = vmul.f32 0.16666667, %v1196_v38  ;;  %1341 = vmatpush.bf16.msrb.mxu1 %v2916_v30  ;;  %v2921_v38 = vld [vmem:[%s4044_s11 + $0x20] sm:$0xff]  ;;  %v2918_v0 = vld [vmem:[%s4044_s11 + $0x8] sm:$0xff] }
 0x190   : > { %v3461_v23 = vmul.f32 0.16666667, %v1200_v12 }
 0x191   : > { %v1054_v21 = vadd.f32 %v1046_v1, %v1028_v44  ;;  %v1132_v25 = vadd.f32 %v1124_v2, %v1106_v8  ;;  %v1185_v17 = vmax.f32 %v1177_v55, 0.0  ;;  %v1212_v15 = vadd.f32 %v3443_v39, %v3446_v49 }
 0x192   : > { %v3029_v45 = vpop.eup %3028 }
 0x193   : > { %v1080_v28 = vadd.f32 %v1072_v22, %v1054_v21  ;;  %v1158_v33 = vadd.f32 %v1150_v3, %v1132_v25  ;;  %v1193_v48 = vmin.f32 %v1185_v17, 6.0  ;;  %v1213_v57 = vadd.f32 %v1212_v15, %v3448_v43  ;;  %1342 = vmatpush.bf16.msrb.mxu1 %v2915_v29  ;;  %v2923_v17 = vld [vmem:[%s4044_s11 + $0x30] sm:$0xff] }
 0x194   : > { %v1226_v6 = vmul.f32 64.0, %v3029_v45  ;;  %vm1230_vm1 = vweird.f32 %v3029_v45 }
 0x195   : > { %v1107_v34 = vadd.f32 %v1099_v56, %v1080_v28  ;;  %v1170_v37 = vadd.f32 %v3390_v40, %v1158_v33  ;;  %v1201_v19 = vmul.f32 %v1193_v48, %v1169_v60  ;;  %v2924_v33 = vld [vmem:[%s4044_s11 + $0x38] sm:$0xff]  ;;  %v2919_v48 = vld [vmem:[%s4044_s11 + $0x10] sm:$0xff] }
 0x196   : > { %v1227_v2 = vsub.f32 1.0, %v1226_v6  ;;  %1433 = vmatpush.bf16.msra.mxu3 %v2924_v33  ;;  %v2562_v33 = vld [vmem:[%s4046_s13] sm:$0xf] }
 0x197   : > { %v1133_v42 = vadd.f32 %v1125_v14, %v1107_v34  ;;  %v1178_v13 = vadd.f32 3.0, %v1170_v37  ;;  %v3464_v59 = vmul.f32 0.16666667, %v1201_v19 }
 0x198   : > { %v1228_v18 = vmul.f32 %v3029_v45, %v1227_v2  ;;  %v2932_v2 = vld [vmem:[%s4046_s13 + $0x34] sm:$0xf0] }
 0x199   : > { %v1159_v50 = vadd.f32 %v1151_v36, %v1133_v42  ;;  %v1186_v63 = vmax.f32 %v1178_v13, 0.0  ;;  %v2920_v13 = vld [vmem:[%s4044_s11 + $0x18] sm:$0xff] }
 0x19a   : > { %v1229_v22 = vadd.f32 %v3029_v45, %v1228_v18  ;;  %1434 = vmatpush.bf16.msra.mxu3 %v2923_v17  ;;  %v2927_v18 = vld [vmem:[%s4046_s13 + $0x14] sm:$0xf]  ;;  %v2926_v17 = vld [vmem:[%s4046_s13 + $0x4] sm:$0xf0] }
 0x19b   : > { %v1171_v51 = vadd.f32 %v3390_v40, %v1159_v50  ;;  %v1194_v52 = vmin.f32 %v1186_v63, 6.0  ;;  %v1214_v40 = vadd.f32 %v1213_v57, %v3456_v54  ;;  %v2917_v50 = vld [vmem:[%s4044_s11] sm:$0xff] }
 0x19c   : > { %v3475_v14 = vsel %vm1230_vm1, %v3029_v45, %v1229_v22  ;;  %v1318_v63 = vld [vmem:[%s4043_s10] sm:$0x1] }
 0x19d   : > { %v1179_v24 = vadd.f32 3.0, %v1171_v51  ;;  %v1202_v53 = vmul.f32 %v1194_v52, %v1170_v37  ;;  %v1215_v5 = vadd.f32 %v1214_v40, %v3461_v23 }
 0x19e   : > { %1435 = vmatpush.bf16.msra.mxu3 %v2922_v7 }
 0x19f   : > { %v1187_v58 = vmax.f32 %v1179_v24, 0.0  ;;  %v3467_v4 = vmul.f32 0.16666667, %v1202_v53  ;;  %v1216_v1 = vadd.f32 %v1215_v5, %v3464_v59  ;;  %v2588_v5 = vld [vmem:[%s4046_s13 + $0x38] sm:$0xf0] }
 0x1a1   : > { %v1195_v60 = vmin.f32 %v1187_v58, 6.0  ;;  %v1217_v27 = vadd.f32 %v1216_v1, %v3467_v4 }
 0x1a2   : > { %1436 = vmatpush.bf16.msra.mxu3 %v2921_v38  ;;  %v2563_v38 = vor.u32 %v2926_v17, %v2562_v33  ;;  %v2954_v33 = vld [vmem:[%s4048_s15 + $0xac] sm:$0xf]  ;;  %v2688_v17 = vld [vmem:[%s4048_s15 + $0xb4] sm:$0xf0] }
 0x1a3   : > { %v1203_v44 = vmul.f32 %v1195_v60, %v1171_v51  ;;  %v2931_v60 = vld [vmem:[%s4046_s13 + $0x34] sm:$0xf] }
 0x1a4   : > { %v2591_v6 = vor.u32 %v2931_v60, %v2588_v5  ;;  %v2979_v60 = vld [vmem:[%s4048_s15 + $0x170] sm:$0xf0] }
 0x1a5   : > { %v3471_v8 = vmul.f32 0.16666667, %v1203_v44 }
 0x1a6   : > { %1437 = vmatpush.bf16.msra.mxu3 %v2920_v13  ;;  %1573 = vmatpush.bf16.msra.mxu1 %v2591_v6 }
 0x1a7   : > { %v1218_v56 = vadd.f32 %v1217_v27, %v3471_v8  ;;  %v2586_v27 = vld [vmem:[%s4046_s13 + $0x30] sm:$0xf] }
 0x1a9   : > { %v1219_v55 = vrot.slane %v1218_v56, 4 }
 0x1aa   : > { %1438 = vmatpush.bf16.msra.mxu3 %v2919_v48 }
 0x1ab   : > { %v1220_v20 = vadd.f32 %v1219_v55, %v1218_v56  ;;  %v2930_v56 = vld [vmem:[%s4046_s13 + $0x24] sm:$0xf0] }
 0x1ad   : > { %v1221_v21 = vrot.slane %v1220_v20, 2 }
 0x1ae   : > { %1439 = vmatpush.bf16.msra.mxu3 %v2918_v0 }
 0x1af   : > { %v1222_v25 = vadd.f32 %v1221_v21, %v1220_v20  ;;  %v2572_v20 = vld [vmem:[%s4046_s13 + $0x18] sm:$0xf0] }
 0x1b0   : > { %v2575_v22 = vor.u32 %v2927_v18, %v2572_v20  ;;  %v2973_v18 = vld [vmem:[%s4048_s15 + $0x140] sm:$0xf0] }
 0x1b1   : > { %v1223_v3 = vrot.slane %v1222_v25, 1 }
 0x1b2   : > { %1440 = vmatpush.bf16.msra.mxu3 %v2917_v50 }
 0x1b3   : > { %v1224_v26 = vadd.f32 %v1223_v3, %v1222_v25  ;;  %v2570_v25 = vld [vmem:[%s4046_s13 + $0x10] sm:$0xf]  ;;  %v2928_v3 = vld [vmem:[%s4046_s13 + $0x14] sm:$0xf0] }
 0x1b5   : > { %v1232_v16 = vmul.f32 %v3475_v14, %v1224_v26  ;;  %v2925_v26 = vld [vmem:[%s4046_s13 + $0x4] sm:$0xf] }
 0x1b7   : > { %v1233_v28 = vpack.c.bf16 %v1232_v16, %v1232_v16  ;;  %v2571_v16 = vor.u32 %v2928_v3, %v2570_v25  ;;  %v2952_v25 = vld [vmem:[%s4048_s15 + $0x98] sm:$0xf0] }
 0x1b9   : > { %1307 = vmatmul.bf16.vlgmr.msra.gmra.mxu2 %v1233_v28  ;;  %v2564_v28 = vld [vmem:[%s4046_s13 + $0x8] sm:$0xf0] }
 0x1ba   : > { %v2567_v7 = vor.u32 %v2925_v26, %v2564_v28 }
 0x23c   : > { %v1308_v34 = vpop.f32.mrf.mxu2 }
 0x23d   : > { %v1309_v36 = vadd.f32 %v1308_v34, %v1250_v35  ;;  %v3027_v34 = vld [vmem:[%s4045_s12] ss:$0 sm:$0xff] }
 0x23f   : > { %v1312_v37 = vmax.f32 %v1309_v36, 0.0 }
 0x241   : > { %v1313_v9 = vpack.c.bf16 %v1312_v37, %v1312_v37 }
 0x243   : > { %2527 = vmatmul.msk.bf16.vlgmr.msrb.gmra.mxu1 %vm1331_vm2, %v1313_v9 }
 0x244   : > { %v1310_v42 = vpop.f32.mrf.mxu2 }
 0x2c0   : > { %v1344_v12 = vpop.f32.mrf.mxu1 }
 0x2c1   : > { %v1345_v41 = vadd.f32 %v1344_v12, %v1318_v63 }
 0x2c3   : > { %v1348_v30 = vadd.f32 3.0, %v1345_v41 }
 0x2c5   : > { %v1349_v15 = vmax.f32 %v1348_v30, 0.0 }
 0x2c7   : > { %v1350_v51 = vmin.f32 %v1349_v15, 6.0 }
 0x2c8   : > { %v1346_v52 = vpop.f32.mrf.mxu1 }
 0x2c9   : > { %v1351_v19 = vmul.f32 0.16666667, %v1350_v51 }
 0x2cb   : > { %v1352_v29 = vperm.slane %v1351_v19, 0 }
 0x2cd   : > { %v1353_v24 = vmul.f32 %v1352_v29, %v3446_v49  ;;  %v1354_v53 = vmul.f32 %v1352_v29, %v3443_v39  ;;  %v1355_v45 = vmul.f32 %v1352_v29, %v3448_v43  ;;  %v1356_v58 = vmul.f32 %v1352_v29, %v3456_v54 }
 0x2ce   : > { %v1357_v39 = vmul.f32 %v1352_v29, %v3461_v23  ;;  %v1358_v49 = vmul.f32 %v1352_v29, %v3464_v59  ;;  %v1359_v43 = vmul.f32 %v1352_v29, %v3467_v4  ;;  %v1360_v54 = vmul.f32 %v1352_v29, %v3471_v8  ;;  %v2929_v23 = vld [vmem:[%s4046_s13 + $0x24] sm:$0xf]  ;;  %v2580_v4 = vld [vmem:[%s4046_s13 + $0x28] sm:$0xf0]  ;;  %v2578_v8 = vld [vmem:[%s4046_s13 + $0x20] sm:$0xf] }
 0x2cf   : > { %v1361_v57 = vpack.c.bf16 %v1354_v53, %v1353_v24  ;;  %v1362_v40 = vpack.c.bf16 %v1356_v58, %v1355_v45  ;;  %v2587_v59 = vor.u32 %v2932_v2, %v2586_v27  ;;  %v2583_v55 = vor.u32 %v2929_v23, %v2580_v4 }
 0x2d0   : > { %v1363_v44 = vpack.c.bf16 %v1358_v49, %v1357_v39  ;;  %v1364_v1 = vpack.c.bf16 %v1360_v54, %v1359_v43  ;;  %v2579_v21 = vor.u32 %v2930_v56, %v2578_v8  ;;  %v2770_v39 = vld [vmem:[%s4048_s15 + $0x150] sm:$0xf]  ;;  %v2976_v49 = vld [vmem:[%s4048_s15 + $0x158] sm:$0xf0]  ;;  %v2686_v43 = vld [vmem:[%s4048_s15 + $0xa8] sm:$0xf] }
 0x2d1   : > { %1441 = vmatmul.bf16.vlgmr.msra.gmra.mxu3 %v1361_v57  ;;  %1544 = vmatpush.bf16.msrb.mxu2 %v2587_v59  ;;  %v2955_v54 = vld [vmem:[%s4048_s15 + $0xb0] sm:$0xf0] }
 0x2d2   : > { %1574 = vmatpush.bf16.msra.mxu1 %v2583_v55  ;;  %v2687_v2 = vor.u32 %v2955_v54, %v2686_v43  ;;  %v2758_v55 = vld [vmem:[%s4048_s15 + $0x138] sm:$0xf] }
 0x2d4   : > { %2036 = vmatpush.bf16.msrb.mxu0 %v2687_v2  ;;  %v2734_v2 = vld [vmem:[%s4048_s15 + $0x108] sm:$0xf] }
 0x2d5   : > { %1545 = vmatpush.bf16.msrb.mxu2 %v2579_v21  ;;  %v2759_v21 = vor.u32 %v2973_v18, %v2758_v55  ;;  %v2967_v18 = vld [vmem:[%s4048_s15 + $0x110] sm:$0xf0] }
 0x2d6   : > { %1575 = vmatpush.bf16.msra.mxu1 %v2575_v22  ;;  %v2674_v22 = vld [vmem:[%s4048_s15 + $0x90] sm:$0xf] }
 0x2d7   : > { %v2675_v28 = vor.u32 %v2952_v25, %v2674_v22 }
 0x2d9   : > { %1546 = vmatpush.bf16.msrb.mxu2 %v2571_v16  ;;  %2037 = vmatpush.bf16.msrb.mxu0 %v2675_v28 }
 0x2da   : > { %1576 = vmatpush.bf16.msra.mxu1 %v2567_v7 }
 0x2dd   : > { %1547 = vmatpush.bf16.msrb.mxu2 %v2563_v38 }
 0x2e1   : > { %1446 = vmatmul.bf16.gmra.mxu3 %v1362_v40 }
 0x2f1   : > { %1451 = vmatmul.bf16.gmra.mxu3 %v1363_v44  ;;  %v2771_v44 = vor.u32 %v2976_v49, %v2770_v39 }
 0x301   : > { %1456 = vmatmul.bf16.gmra.mxu3 %v1364_v1 }
 0x354   : > { %v1442_v35 = vpop.f32.mrf.mxu3 }
 0x355   : > { %v1443_v36 = vadd.f32 %v3027_v34, %v1442_v35 }
 0x357   : > { %v1462_v42 = vadd.f32 %v1443_v36, %v3193_v31 }
 0x35c   : > { %v1444_v37 = vpop.f32.mrf.mxu3 }
 0x35d   : > { %v1445_v9 = vadd.f32 %v3027_v34, %v1444_v37 }
 0x35f   : > { %v1463_v13 = vadd.f32 %v1445_v9, %v3195_v32 }
 0x361   : > { %v1470_v48 = vpack.c.bf16 %v1463_v13, %v1462_v42 }
 0x363   : > { %2592 = vmatmul.msk.bf16.vlgmr.msrb.gmra.mxu2 %vm809_vm0, %v1470_v48  ;;  %2596 = vmatmul.msk.bf16.vlgmr.msra.gmra.mxu1 %vm809_vm0, %v1470_v48 }
 0x364   : > { %v1447_v0 = vpop.f32.mrf.mxu3 }
 0x365   : > { %v1448_v50 = vadd.f32 %v3027_v34, %v1447_v0 }
 0x367   : > { %v1464_v41 = vadd.f32 %v1448_v50, %v3200_v46 }
 0x36c   : > { %v1449_v63 = vpop.f32.mrf.mxu3 }
 0x36d   : > { %v1450_v12 = vadd.f32 %v3027_v34, %v1449_v63 }
 0x36f   : > { %v1465_v30 = vadd.f32 %v1450_v12, %v3202_v47  ;;  %v2746_v12 = vld [vmem:[%s4048_s15 + $0x120] sm:$0xf] }
 0x371   : > { %v1471_v15 = vpack.c.bf16 %v1465_v30, %v1464_v41  ;;  %v2970_v41 = vld [vmem:[%s4048_s15 + $0x128] sm:$0xf0]  ;;  %v2790_v30 = vld [vmem:[%s4048_s15 + $0x170] sm:$0xf] }
 0x373   : > { %2593 = vmatmul.msk.bf16.gmra.mxu2 %vm809_vm0, %v1471_v15  ;;  %2597 = vmatmul.msk.bf16.gmra.mxu1 %vm809_vm0, %v1471_v15  ;;  %v2980_v15 = vld [vmem:[%s4048_s15 + $0x178] sm:$0xf0] }
 0x374   : > { %v1452_v31 = vpop.f32.mrf.mxu3 }
 0x375   : > { %v1453_v32 = vadd.f32 %v3027_v34, %v1452_v31 }
 0x377   : > { %v1466_v19 = vadd.f32 %v1453_v32, %v3207_v61  ;;  %v2747_v32 = vor.u32 %v2970_v41, %v2746_v12 }
 0x37c   : > { %v1454_v51 = vpop.f32.mrf.mxu3 }
 0x37d   : > { %v1455_v52 = vadd.f32 %v3027_v34, %v1454_v51  ;;  %v2662_v51 = vld [vmem:[%s4048_s15 + $0x78] sm:$0xf] }
 0x37f   : > { %v1467_v29 = vadd.f32 %v1455_v52, %v3209_v62  ;;  %v2782_v62 = vld [vmem:[%s4048_s15 + $0x168] sm:$0xf]  ;;  %v2949_v52 = vld [vmem:[%s4048_s15 + $0x80] sm:$0xf0] }
 0x380   : > { %v2783_v5 = vor.u32 %v2979_v60, %v2782_v62 }
 0x381   : > { %v1472_v24 = vpack.c.bf16 %v1467_v29, %v1466_v19 }
 0x382   : > { %2049 = vmatpush.bf16.msrb.mxu3 %v2783_v5 }
 0x383   : > { %2594 = vmatmul.msk.bf16.gmra.mxu2 %vm809_vm0, %v1472_v24  ;;  %2598 = vmatmul.msk.bf16.gmra.mxu1 %vm809_vm0, %v1472_v24 }
 0x384   : > { %v1457_v46 = vpop.f32.mrf.mxu3 }
 0x385   : > { %v1458_v47 = vadd.f32 %v3027_v34, %v1457_v46  ;;  %v2791_v46 = vor.u32 %v2980_v15, %v2790_v30  ;;  %v2948_v30 = vld [vmem:[%s4048_s15 + $0x7c] sm:$0xf] }
 0x386   : > { %2050 = vmatpush.bf16.msrb.mxu3 %v2771_v44 }
 0x387   : > { %v1468_v45 = vadd.f32 %v1458_v47, %v3214_v10  ;;  %v2663_v47 = vor.u32 %v2949_v52, %v2662_v51  ;;  %2101 = vmatpush.bf16.msrb.mxu1 %v2791_v46  ;;  %v2722_v51 = vld [vmem:[%s4048_s15 + $0xf0] sm:$0xf]  ;;  %v2964_v52 = vld [vmem:[%s4048_s15 + $0xf8] sm:$0xf0]  ;;  %v2766_v46 = vld [vmem:[%s4048_s15 + $0x140] sm:$0xf] }
 0x389   : > { %2038 = vmatpush.bf16.msrb.mxu0 %v2663_v47  ;;  %v2974_v47 = vld [vmem:[%s4048_s15 + $0x148] sm:$0xf0] }
 0x38a   : > { %2051 = vmatpush.bf16.msrb.mxu3 %v2759_v21  ;;  %v2778_v21 = vld [vmem:[%s4048_s15 + $0x158] sm:$0xf] }
 0x38c   : > { %v1459_v53 = vpop.f32.mrf.mxu3 }
 0x38d   : > { %v1460_v57 = vadd.f32 %v3027_v34, %v1459_v53  ;;  %v2691_v34 = vor.u32 %v2954_v33, %v2688_v17  ;;  %v2951_v53 = vld [vmem:[%s4048_s15 + $0x94] sm:$0xf] }
 0x38e   : > { %2052 = vmatpush.bf16.msrb.mxu3 %v2747_v32  ;;  %v2664_v32 = vld [vmem:[%s4048_s15 + $0x84] sm:$0xf0] }
 0x38f   : > { %v1469_v58 = vadd.f32 %v1460_v57, %v3216_v11  ;;  %v1482_v11 = vld [vmem:[%s4047_s14] sm:$0x3]  ;;  %2062 = vmatpush.bf16.msra.mxu2 %v2691_v34 }
 0x390   : > { %v3604_v1 = vperm.slane %v1482_v11, 1  ;;  %v3606_v23 = vperm.slane %v1482_v11, 0  ;;  %v2676_v57 = vld [vmem:[%s4048_s15 + $0x9c] sm:$0xf0] }
 0x391   : > { %v1473_v40 = vpack.c.bf16 %v1469_v58, %v1468_v45 }
 0x393   : > { %2595 = vmatmul.msk.bf16.gmra.mxu2 %vm809_vm0, %v1473_v40  ;;  %2599 = vmatmul.msk.bf16.gmra.mxu1 %vm809_vm0, %v1473_v40 }
 0x3e0   : > { %v1578_v61 = vpop.f32.mrf.mxu1 }
 0x3e1   : > { %v1579_v4 = vadd.f32 %v1578_v61, %v3604_v1  ;;  %v2679_v61 = vor.u32 %v2951_v53, %v2676_v57 }
 0x3e3   : > { %v1599_v3 = vadd.f32 3.0, %v1579_v4  ;;  %2063 = vmatpush.bf16.msra.mxu2 %v2679_v61  ;;  %v2943_v61 = vld [vmem:[%s4048_s15 + $0x50] sm:$0xf0] }
 0x3e5   : > { %v1615_v48 = vmax.f32 %v1599_v3, 0.0  ;;  %v2735_v3 = vor.u32 %v2967_v18, %v2734_v2  ;;  %v2626_v18 = vld [vmem:[%s4048_s15 + $0x30] sm:$0xf] }
 0x3e6   : > { %v1549_v6 = vpop.f32.mrf.mxu2 }
 0x3e7   : > { %v3610_v8 = vadd.f32 %v1549_v6, %v3606_v23  ;;  %v1631_v45 = vmin.f32 %v1615_v48, 6.0  ;;  %2053 = vmatpush.bf16.msrb.mxu3 %v2735_v3 }
 0x3e8   : > { %v1580_v10 = vpop.f32.mrf.mxu1 }
 0x3e9   : > { %v3613_v56 = vadd.f32 %v1580_v10, %v3604_v1  ;;  %v1598_v7 = vadd.f32 3.0, %v3610_v8  ;;  %v1647_v44 = vmul.f32 %v1631_v45, %v1579_v4  ;;  %v2977_v4 = vld [vmem:[%s4048_s15 + $0x160] sm:$0xf0]  ;;  %v2723_v45 = vor.u32 %v2964_v52, %v2722_v51 }
 0x3ea   : > { %v2779_v33 = vor.u32 %v2977_v4, %v2778_v21  ;;  %v2940_v4 = vld [vmem:[%s4048_s15 + $0x38] sm:$0xf0] }
 0x3eb   : > { %v1601_v38 = vadd.f32 3.0, %v3613_v56  ;;  %v1614_v0 = vmax.f32 %v1598_v7, 0.0  ;;  %v3687_v17 = vmul.f32 0.16666667, %v1647_v44  ;;  %2054 = vmatpush.bf16.msrb.mxu3 %v2723_v45  ;;  %v2965_v45 = vld [vmem:[%s4048_s15 + $0x100] sm:$0xf0] }
 0x3ec   : > { %2102 = vmatpush.bf16.msrb.mxu1 %v2779_v33 }
 0x3ed   : > { %v1617_v50 = vmax.f32 %v1601_v38, 0.0  ;;  %v1630_v62 = vmin.f32 %v1614_v0, 6.0 }
 0x3ee   : > { %v1551_v27 = vpop.f32.mrf.mxu2 }
 0x3ef   : > { %v3622_v20 = vadd.f32 %v1551_v27, %v3606_v23  ;;  %v1633_v60 = vmin.f32 %v1617_v50, 6.0  ;;  %v2946_v50 = vld [vmem:[%s4048_s15 + $0x68] sm:$0xf0] }
 0x3f0   : > { %v1583_v59 = vpop.f32.mrf.mxu1 }
 0x3f1   : > { %v3631_v26 = vadd.f32 %v1583_v59, %v3604_v1  ;;  %v1600_v37 = vadd.f32 3.0, %v3622_v20  ;;  %v1646_v59 = vmul.f32 %v1630_v62, %v3610_v8  ;;  %v1649_v55 = vmul.f32 %v1633_v60, %v3613_v56 }
 0x3f3   : > { %v1603_v42 = vadd.f32 3.0, %v3631_v26  ;;  %v1616_v31 = vmax.f32 %v1600_v37, 0.0  ;;  %v3690_v34 = vmul.f32 0.16666667, %v1646_v59 }
 0x3f5   : > { %v1619_v19 = vmax.f32 %v1603_v42, 0.0  ;;  %v1632_v6 = vmin.f32 %v1616_v31, 6.0 }
 0x3f6   : > { %v1554_v16 = vpop.f32.mrf.mxu2 }
 0x3f7   : > { %v1555_v35 = vadd.f32 %v1554_v16, %v3606_v23  ;;  %v1635_v39 = vmin.f32 %v1619_v19, 6.0  ;;  %v1648_v22 = vmul.f32 %v1632_v6, %v3622_v20 }
 0x3f8   : > { %v1585_v36 = vpop.f32.mrf.mxu1 }
 0x3f9   : > { %v1586_v9 = vadd.f32 %v1585_v36, %v3604_v1  ;;  %v1602_v13 = vadd.f32 3.0, %v1555_v35  ;;  %v1651_v8 = vmul.f32 %v1635_v39, %v3631_v26  ;;  %v3692_v36 = vmul.f32 0.16666667, %v1649_v55 }
 0x3fa   : > { %v3694_v42 = vmul.f32 0.16666667, %v1648_v22  ;;  %v2945_v22 = vld [vmem:[%s4048_s15 + $0x64] sm:$0xf] }
 0x3fb   : > { %v1605_v63 = vadd.f32 3.0, %v1586_v9  ;;  %v1618_v29 = vmax.f32 %v1602_v13, 0.0  ;;  %v2650_v13 = vld [vmem:[%s4048_s15 + $0x60] sm:$0xf] }
 0x3fc   : > { %v2651_v31 = vor.u32 %v2946_v50, %v2650_v13  ;;  %v2742_v13 = vld [vmem:[%s4048_s15 + $0x110] sm:$0xf] }
 0x3fd   : > { %v1621_v58 = vmax.f32 %v1605_v63, 0.0  ;;  %v1634_v49 = vmin.f32 %v1618_v29, 6.0 }
 0x3fe   : > { %v1556_v24 = vpop.f32.mrf.mxu2  ;;  %2039 = vmatpush.bf16.msrb.mxu0 %v2651_v31  ;;  %v2682_v31 = vld [vmem:[%s4048_s15 + $0x98] sm:$0xf] }
 0x3ff   : > { %v1557_v40 = vadd.f32 %v1556_v24, %v3606_v23  ;;  %v1637_v43 = vmin.f32 %v1621_v58, 6.0  ;;  %v1650_v16 = vmul.f32 %v1634_v49, %v1555_v35  ;;  %v2667_v24 = vor.u32 %v2948_v30, %v2664_v32  ;;  %v2614_v30 = vld [vmem:[%s4048_s15 + $0x18] sm:$0xf] }
 0x400   : > { %v1588_v5 = vpop.f32.mrf.mxu1  ;;  %v2767_v58 = vor.u32 %v2974_v47, %v2766_v46  ;;  %v1691_v46 = vadd.f32 %v3692_v36, %v3687_v17 }
 0x401   : > { %v1604_v10 = vadd.f32 3.0, %v1557_v40  ;;  %v1589_v11 = vadd.f32 %v1588_v5, %v3604_v1  ;;  %v1653_v7 = vmul.f32 %v1637_v43, %v1586_v9  ;;  %v3700_v9 = vmul.f32 0.16666667, %v1651_v8  ;;  %2064 = vmatpush.bf16.msra.mxu2 %v2667_v24  ;;  %v2754_v43 = vld [vmem:[%s4048_s15 + $0x128] sm:$0xf] }
 0x402   : > { %v3702_v48 = vmul.f32 0.16666667, %v1650_v16  ;;  %2103 = vmatpush.bf16.msrb.mxu1 %v2767_v58  ;;  %v2730_v24 = vld [vmem:[%s4048_s15 + $0xf8] sm:$0xf]  ;;  %v2602_v58 = vld [vmem:[%s4048_s15] sm:$0xf] }
 0x403   : > { %v1620_v54 = vmax.f32 %v1604_v10, 0.0  ;;  %v1607_v27 = vadd.f32 3.0, %v1589_v11  ;;  %v3707_v63 = vmul.f32 0.16666667, %v1653_v7  ;;  %v2710_v10 = vld [vmem:[%s4048_s15 + $0xd8] sm:$0xf] }
 0x404   : > { %v2958_v7 = vld [vmem:[%s4048_s15 + $0xc8] sm:$0xf0] }
 0x405   : > { %v1623_v25 = vmax.f32 %v1607_v27, 0.0  ;;  %v1636_v56 = vmin.f32 %v1620_v54, 6.0  ;;  %v2971_v54 = vld [vmem:[%s4048_s15 + $0x130] sm:$0xf0] }
 0x406   : > { %v1559_v28 = vpop.f32.mrf.mxu2  ;;  %v2755_v21 = vor.u32 %v2971_v54, %v2754_v43 }
 0x407   : > { %v1560_v38 = vadd.f32 %v1559_v28, %v3606_v23  ;;  %v1639_v37 = vmin.f32 %v1623_v25, 6.0  ;;  %v1652_v0 = vmul.f32 %v1636_v56, %v1557_v40  ;;  %v2638_v40 = vld [vmem:[%s4048_s15 + $0x48] sm:$0xf]  ;;  %v2652_v25 = vld [vmem:[%s4048_s15 + $0x6c] sm:$0xf0]  ;;  %v2627_v28 = vor.u32 %v2940_v4, %v2626_v18 }
 0x408   : > { %v1590_v20 = vpop.f32.mrf.mxu1  ;;  %v2639_v6 = vor.u32 %v2943_v61, %v2638_v40  ;;  %v2698_v56 = vld [vmem:[%s4048_s15 + $0xc0] sm:$0xf]  ;;  %2104 = vmatpush.bf16.msrb.mxu1 %v2755_v21  ;;  %v2655_v33 = vor.u32 %v2945_v22, %v2652_v25  ;;  %v2934_v40 = vld [vmem:[%s4048_s15 + $0x8] sm:$0xf0]  ;;  %v1678_v22 = vadd.f32 %v3694_v42, %v3690_v34  ;;  %v2975_v34 = vld [vmem:[%s4048_s15 + $0x154] sm:$0xf] }
 0x409   : > { %v1606_v26 = vadd.f32 3.0, %v1560_v38  ;;  %v1591_v35 = vadd.f32 %v1590_v20, %v3604_v1  ;;  %v1655_v15 = vmul.f32 %v1639_v37, %v1589_v11  ;;  %v3727_v53 = vmul.f32 0.16666667, %v1652_v0  ;;  %v2961_v11 = vld [vmem:[%s4048_s15 + $0xe0] sm:$0xf0] }
 0x40a   : > { %v2711_v44 = vor.u32 %v2961_v11, %v2710_v10  ;;  %2040 = vmatpush.bf16.msrb.mxu0 %v2639_v6  ;;  %v2956_v37 = vld [vmem:[%s4048_s15 + $0xb8] sm:$0xf0]  ;;  %2065 = vmatpush.bf16.msra.mxu2 %v2655_v33  ;;  %v2731_v6 = vor.u32 %v2965_v45, %v2730_v24  ;;  %v2603_v10 = vor.u32 %v2934_v40, %v2602_v58  ;;  %v2640_v11 = vld [vmem:[%s4048_s15 + $0x54] sm:$0xf0]  ;;  %v2950_v18 = vld [vmem:[%s4048_s15 + $0x88] sm:$0xf0] }
 0x40b   : > { %v1622_v12 = vmax.f32 %v1606_v26, 0.0  ;;  %v1609_v41 = vadd.f32 3.0, %v1591_v35  ;;  %v3742_v39 = vmul.f32 0.16666667, %v1655_v15  ;;  %v2968_v0 = vld [vmem:[%s4048_s15 + $0x118] sm:$0xf0] }
 0x40c   : > { %2055 = vmatpush.bf16.msrb.mxu3 %v2711_v44  ;;  %v2937_v15 = vld [vmem:[%s4048_s15 + $0x20] sm:$0xf0]  ;;  %v2718_v21 = vld [vmem:[%s4048_s15 + $0xe0] sm:$0xf]  ;;  %v2962_v4 = vld [vmem:[%s4048_s15 + $0xe8] sm:$0xf0] }
 0x40d   : > { %v1638_v19 = vmin.f32 %v1622_v12, 6.0  ;;  %v1625_v29 = vmax.f32 %v1609_v41, 0.0  ;;  %v2743_v41 = vor.u32 %v2968_v0, %v2742_v13  ;;  %v2772_v42 = vld [vmem:[%s4048_s15 + $0x15c] sm:$0xf0]  ;;  %v2706_v13 = vld [vmem:[%s4048_s15 + $0xc8] sm:$0xf]  ;;  %v1679_v0 = vadd.f32 %v1678_v22, %v3702_v48 }
 0x40e   : > { %v1561_v57 = vpop.f32.mrf.mxu2  ;;  %2041 = vmatpush.bf16.msrb.mxu0 %v2627_v28  ;;  %v2944_v24 = vld [vmem:[%s4048_s15 + $0x58] sm:$0xf0]  ;;  %v2604_v40 = vld [vmem:[%s4048_s15 + $0xc] sm:$0xf0] }
 0x40f   : > { %v1654_v62 = vmul.f32 %v1638_v19, %v1560_v38  ;;  %v1641_v60 = vmin.f32 %v1625_v29, 6.0  ;;  %v1562_v5 = vadd.f32 %v1561_v57, %v3606_v23  ;;  %v2694_v38 = vld [vmem:[%s4048_s15 + $0xb0] sm:$0xf]  ;;  %v2615_v19 = vor.u32 %v2937_v15, %v2614_v30  ;;  %v2953_v29 = vld [vmem:[%s4048_s15 + $0xa0] sm:$0xf0]  ;;  %2105 = vmatpush.bf16.msrb.mxu1 %v2743_v41 }
 0x410   : > { %v1593_v49 = vpop.f32.mrf.mxu1  ;;  %v2695_v12 = vor.u32 %v2956_v37, %v2694_v38  ;;  %v2683_v57 = vor.u32 %v2953_v29, %v2682_v31  ;;  %v2658_v37 = vld [vmem:[%s4048_s15 + $0x68] sm:$0xf]  ;;  %v2936_v41 = vld [vmem:[%s4048_s15 + $0x1c] sm:$0xf]  ;;  %v2646_v29 = vld [vmem:[%s4048_s15 + $0x50] sm:$0xf] }
 0x411   : > { %v3750_v27 = vmul.f32 0.16666667, %v1654_v62  ;;  %v1657_v2 = vmul.f32 %v1641_v60, %v1591_v35  ;;  %v1608_v59 = vadd.f32 3.0, %v1562_v5  ;;  %v1594_v55 = vadd.f32 %v1593_v49, %v3604_v1  ;;  %v2942_v60 = vld [vmem:[%s4048_s15 + $0x4c] sm:$0xf] }
 0x412   : > { %v2699_v35 = vor.u32 %v2958_v7, %v2698_v56  ;;  %2042 = vmatpush.bf16.msrb.mxu0 %v2615_v19  ;;  %v2978_v49 = vld [vmem:[%s4048_s15 + $0x16c] sm:$0xf]  ;;  %v2628_v56 = vld [vmem:[%s4048_s15 + $0x3c] sm:$0xf0]  ;;  %v2719_v7 = vor.u32 %v2962_v4, %v2718_v21  ;;  %v2616_v30 = vld [vmem:[%s4048_s15 + $0x24] sm:$0xf0] }
 0x413   : > { %v3765_v3 = vmul.f32 0.16666667, %v1657_v2  ;;  %v1624_v8 = vmax.f32 %v1608_v59, 0.0  ;;  %v1611_v16 = vadd.f32 3.0, %v1594_v55  ;;  %2106 = vmatpush.bf16.msrb.mxu1 %v2731_v6  ;;  %v2643_v59 = vor.u32 %v2942_v60, %v2640_v11  ;;  %v2760_v19 = vld [vmem:[%s4048_s15 + $0x144] sm:$0xf0] }
 0x414   : > { %2056 = vmatpush.bf16.msrb.mxu3 %v2699_v35  ;;  %v2947_v35 = vld [vmem:[%s4048_s15 + $0x70] sm:$0xf0]  ;;  %v2647_v6 = vor.u32 %v2944_v24, %v2646_v29  ;;  %v2941_v11 = vld [vmem:[%s4048_s15 + $0x40] sm:$0xf0]  ;;  %v2938_v21 = vld [vmem:[%s4048_s15 + $0x28] sm:$0xf0] }
 0x415   : > { %v1640_v20 = vmin.f32 %v1624_v8, 6.0  ;;  %v1627_v26 = vmax.f32 %v1611_v16, 0.0  ;;  %v2939_v16 = vld [vmem:[%s4048_s15 + $0x34] sm:$0xf]  ;;  %2066 = vmatpush.bf16.msra.mxu2 %v2643_v59  ;;  %v2659_v48 = vor.u32 %v2947_v35, %v2658_v37  ;;  %v2984_v29 = vld [vmem:[%s4050_s17 + $0x18] sm:$0xff] }
 0x416   : > { %v1564_v50 = vpop.f32.mrf.mxu2  ;;  %2043 = vmatpush.bf16.msrb.mxu0 %v2603_v10  ;;  %v2631_v38 = vor.u32 %v2939_v16, %v2628_v56  ;;  %v2634_v10 = vld [vmem:[%s4048_s15 + $0x38] sm:$0xf] }
 0x417   : > { %v1656_v32 = vmul.f32 %v1640_v20, %v1562_v5  ;;  %v1643_v51 = vmin.f32 %v1627_v26, 6.0  ;;  %v1565_v52 = vadd.f32 %v1564_v50, %v3606_v23  ;;  %v1692_v5 = vadd.f32 %v1691_v46, %v3700_v9  ;;  %v2670_v9 = vld [vmem:[%s4048_s15 + $0x80] sm:$0xf]  ;;  %2107 = vmatpush.bf16.msrb.mxu1 %v2719_v7  ;;  %v2610_v7 = vld [vmem:[%s4048_s15 + $0x8] sm:$0xf]  ;;  %v3004_v24 = vld [vmem:[%s4050_s17 + $0xb8] sm:$0xff] }
 0x418   : > { %v1595_v47 = vpop.f32.mrf.mxu1  ;;  %2088 = vmatpush.bf16.msra.mxu3 %v2695_v12  ;;  %v2671_v8 = vor.u32 %v2950_v18, %v2670_v9  ;;  %v2775_v26 = vor.u32 %v2975_v34, %v2772_v42  ;;  %v2736_v9 = vld [vmem:[%s4048_s15 + $0x114] sm:$0xf0]  ;;  %v2635_v18 = vor.u32 %v2941_v11, %v2634_v10  ;;  %v2991_v10 = vld [vmem:[%s4050_s17 + $0x50] sm:$0xff] }
 0x419   : > { %v3812_v61 = vmul.f32 0.16666667, %v1656_v32  ;;  %v1659_v62 = vmul.f32 %v1643_v51, %v1594_v55  ;;  %v1610_v17 = vadd.f32 3.0, %v1565_v52  ;;  %v1596_v36 = vadd.f32 %v1595_v47, %v3604_v1  ;;  %v2784_v1 = vld [vmem:[%s4048_s15 + $0x174] sm:$0xf0]  ;;  %2067 = vmatpush.bf16.msra.mxu2 %v2631_v38 }
 0x41a   : > { %v1693_v2 = vadd.f32 %v1692_v5, %v3707_v63  ;;  %v2787_v55 = vor.u32 %v2978_v49, %v2784_v1  ;;  %v1680_v51 = vadd.f32 %v1679_v0, %v3727_v53  ;;  %v2933_v53 = vld [vmem:[%s4048_s15 + $0x4] sm:$0xf]  ;;  %v2935_v38 = vld [vmem:[%s4048_s15 + $0x10] sm:$0xf0]  ;;  %v2712_v0 = vld [vmem:[%s4048_s15 + $0xe4] sm:$0xf0] }
 0x41b   : > { %v1675_v44 = vmul.f32 0.16666667, %v1659_v62  ;;  %v1626_v43 = vmax.f32 %v1610_v17, 0.0  ;;  %v1613_v54 = vadd.f32 3.0, %v1596_v36  ;;  %v2969_v62 = vld [vmem:[%s4048_s15 + $0x124] sm:$0xf]  ;;  %v2611_v35 = vor.u32 %v2935_v38, %v2610_v7 }
 0x41c   : > { %2089 = vmatpush.bf16.msra.mxu3 %v2683_v57  ;;  %v1694_v28 = vadd.f32 %v1693_v2, %v3742_v39  ;;  %2075 = vmatpush.bf16.msra.mxu0 %v2787_v55  ;;  %v1681_v58 = vadd.f32 %v1680_v51, %v3750_v27  ;;  %v2748_v17 = vld [vmem:[%s4048_s15 + $0x12c] sm:$0xf0]  ;;  %v2607_v27 = vor.u32 %v2933_v53, %v2604_v40  ;;  %v2982_v53 = vld [vmem:[%s4050_s17 + $0x8] sm:$0xff]  ;;  %v2993_v40 = vld [vmem:[%s4050_s17 + $0x60] sm:$0xff] }
 0x41d   : > { %v1642_v25 = vmin.f32 %v1626_v43, 6.0  ;;  %v1629_v63 = vmax.f32 %v1613_v54, 0.0  ;;  %v2751_v43 = vor.u32 %v2969_v62, %v2748_v17  ;;  %v2966_v54 = vld [vmem:[%s4048_s15 + $0x10c] sm:$0xf]  ;;  %v2981_v62 = vld [vmem:[%s4050_s17] sm:$0xff] }
 0x41e   : > { %v1566_v33 = vpop.f32.mrf.mxu2  ;;  %v1695_v50 = vadd.f32 %v1694_v28, %v3765_v3  ;;  %v2972_v3 = vld [vmem:[%s4048_s15 + $0x13c] sm:$0xf]  ;;  %v1682_v49 = vadd.f32 %v1681_v58, %v3812_v61  ;;  %v2622_v61 = vld [vmem:[%s4048_s15 + $0x20] sm:$0xf]  ;;  %v3002_v58 = vld [vmem:[%s4050_s17 + $0xa8] sm:$0xff] }
 0x41f   : > { %v1645_v20 = vmin.f32 %v1629_v63, 6.0  ;;  %v1567_v39 = vadd.f32 %v1566_v33, %v3606_v23  ;;  %v1658_v12 = vmul.f32 %v1642_v25, %v1565_v52  ;;  %v2959_v23 = vld [vmem:[%s4048_s15 + $0xd0] sm:$0xf0]  ;;  %v2619_v52 = vor.u32 %v2936_v41, %v2616_v30  ;;  %v2988_v33 = vld [vmem:[%s4050_s17 + $0x38] sm:$0xff]  ;;  %v3001_v17 = vld [vmem:[%s4050_s17 + $0xa0] sm:$0xff] }
 0x420   : > { %2090 = vmatpush.bf16.msra.mxu3 %v2671_v8  ;;  %v2707_v32 = vor.u32 %v2959_v23, %v2706_v13  ;;  %v1696_v46 = vadd.f32 %v1695_v50, %v1675_v44  ;;  %2076 = vmatpush.bf16.msra.mxu0 %v2775_v26  ;;  %v2763_v45 = vor.u32 %v2972_v3, %v2760_v19  ;;  %v2963_v63 = vld [vmem:[%s4048_s15 + $0xf4] sm:$0xf]  ;;  %v2724_v8 = vld [vmem:[%s4048_s15 + $0xfc] sm:$0xf0]  ;;  %v2960_v13 = vld [vmem:[%s4048_s15 + $0xdc] sm:$0xf] }
 0x421   : > { %v1661_v15 = vmul.f32 %v1645_v20, %v1596_v36  ;;  %v1612_v31 = vadd.f32 3.0, %v1567_v39  ;;  %v1674_v36 = vmul.f32 0.16666667, %v1658_v12  ;;  %2068 = vmatpush.bf16.msra.mxu2 %v2619_v52  ;;  %v2739_v25 = vor.u32 %v2966_v54, %v2736_v9  ;;  %v2987_v20 = vld [vmem:[%s4050_s17 + $0x30] sm:$0xff]  ;;  %v2986_v52 = vld [vmem:[%s4050_s17 + $0x28] sm:$0xff]  ;;  %v2985_v19 = vld [vmem:[%s4050_s17 + $0x20] sm:$0xff] }
 0x422   : > { %2108 = vmatpush.bf16.msrb.mxu1 %v2707_v32  ;;  %v2623_v28 = vor.u32 %v2938_v21, %v2622_v61  ;;  %v2727_v37 = vor.u32 %v2963_v63, %v2724_v8  ;;  %v2715_v23 = vor.u32 %v2960_v13, %v2712_v0  ;;  %v2990_v9 = vld [vmem:[%s4050_s17 + $0x48] sm:$0xff]  ;;  %v2989_v61 = vld [vmem:[%s4050_s17 + $0x40] sm:$0xff] }
 0x423   : > { %v1677_v47 = vmul.f32 0.16666667, %v1661_v15  ;;  %v1628_v57 = vmax.f32 %v1612_v31, 0.0  ;;  %v1683_v2 = vadd.f32 %v1682_v49, %v1674_v36  ;;  %v2957_v15 = vld [vmem:[%s4048_s15 + $0xc4] sm:$0xf] }
 0x424   : > { %2091 = vmatpush.bf16.msra.mxu3 %v2659_v48  ;;  %2077 = vmatpush.bf16.msra.mxu0 %v2763_v45  ;;  %v2700_v31 = vld [vmem:[%s4048_s15 + $0xcc] sm:$0xf0]  ;;  %v2994_v45 = vld [vmem:[%s4050_s17 + $0x68] sm:$0xff] }
 0x425   : > { %v1697_v60 = vadd.f32 %v1696_v46, %v1677_v47  ;;  %v1644_v5 = vmin.f32 %v1628_v57, 6.0  ;;  %2069 = vmatpush.bf16.msra.mxu2 %v2607_v27  ;;  %v2703_v32 = vor.u32 %v2957_v15, %v2700_v31  ;;  %v2995_v46 = vld [vmem:[%s4050_s17 + $0x70] sm:$0xff]  ;;  %v3000_v27 = vld [vmem:[%s4050_s17 + $0x98] sm:$0xff] }
 0x426   : > { %v2983_v47 = vld [vmem:[%s4050_s17 + $0x10] sm:$0xff] }
 0x427   : > { %v1698_v1 = vrot.slane %v1697_v60, 4  ;;  %v1660_v44 = vmul.f32 %v1644_v5, %v1567_v39  ;;  %v3003_v57 = vld [vmem:[%s4050_s17 + $0xb0] sm:$0xff] }
 0x428   : > { %2092 = vmatpush.bf16.msra.mxu3 %v2647_v6  ;;  %2078 = vmatpush.bf16.msra.mxu0 %v2751_v43  ;;  %v2992_v6 = vld [vmem:[%s4050_s17 + $0x58] sm:$0xff] }
 0x429   : > { %v1699_v59 = vadd.f32 %v1698_v1, %v1697_v60  ;;  %v1676_v55 = vmul.f32 0.16666667, %v1660_v44  ;;  %2325 = vmatpush.bf16.msrb.mxu2 %v2988_v33  ;;  %v1772_v60 = vld [vmem:[%s4049_s16] sm:$0x7]  ;;  %v2999_v44 = vld [vmem:[%s4050_s17 + $0x90] sm:$0xff] }
 0x42a   : > { %v2030_v5 = vperm.slane %v1772_v60, 0  ;;  %v2031_v8 = vperm.slane %v1772_v60, 1 }
 0x42b   : > { %v1700_v4 = vrot.slane %v1699_v59, 2  ;;  %v1684_v22 = vadd.f32 %v1683_v2, %v1676_v55 }
 0x42c   : > { %2093 = vmatpush.bf16.msra.mxu3 %v2635_v18  ;;  %2079 = vmatpush.bf16.msra.mxu0 %v2739_v25  ;;  %v2997_v25 = vld [vmem:[%s4050_s17 + $0x80] sm:$0xff] }
 0x42d   : > { %v1685_v16 = vrot.slane %v1684_v22, 4  ;;  %v1701_v56 = vadd.f32 %v1700_v4, %v1699_v59  ;;  %2326 = vmatpush.bf16.msrb.mxu2 %v2987_v20  ;;  %v2998_v59 = vld [vmem:[%s4050_s17 + $0x88] sm:$0xff] }
 0x42f   : > { %v1686_v34 = vadd.f32 %v1685_v16, %v1684_v22  ;;  %v1702_v42 = vrot.slane %v1701_v56, 1 }
 0x430   : > { %2094 = vmatpush.bf16.msra.mxu3 %v2623_v28  ;;  %2080 = vmatpush.bf16.msra.mxu0 %v2727_v37 }
 0x431   : > { %v1687_v39 = vrot.slane %v1686_v34, 2  ;;  %v1703_v26 = vadd.f32 %v1702_v42, %v1701_v56  ;;  %2327 = vmatpush.bf16.msrb.mxu2 %v2986_v52  ;;  %v2032_v56 = vperm.slane %v1772_v60, 2 }
 0x433   : > { %v1705_v50 = vmul.f32 %v1703_v26, %v3475_v14  ;;  %v1688_v12 = vadd.f32 %v1687_v39, %v1686_v34 }
 0x434   : > { %2095 = vmatpush.bf16.msra.mxu3 %v2611_v35  ;;  %2081 = vmatpush.bf16.msra.mxu0 %v2715_v23 }
 0x435   : > { %v1707_v41 = vpack.c.bf16 %v1705_v50, %v1705_v50  ;;  %v1689_v30 = vrot.slane %v1688_v12, 1  ;;  %2328 = vmatpush.bf16.msrb.mxu2 %v2985_v19  ;;  %v2180_v19 = vld [vmem:[%s4051_s18] sm:$0x1] }
 0x437   : > { %2057 = vmatmul.bf16.vlgmr.msrb.gmra.mxu3 %v1707_v41  ;;  %2109 = vmatmul.bf16.vlgmr.msrb.gmra.mxu1 %v1707_v41  ;;  %v1690_v48 = vadd.f32 %v1689_v30, %v1688_v12 }
 0x438   : > { %2082 = vmatpush.bf16.msra.mxu0 %v2703_v32  ;;  %2351 = vmatpush.bf16.msrb.mxu3 %v3004_v24 }
 0x439   : > { %v1704_v3 = vmul.f32 %v1690_v48, %v3475_v14  ;;  %v2996_v14 = vld [vmem:[%s4050_s17 + $0x78] sm:$0xff]  ;;  %2329 = vmatpush.bf16.msrb.mxu2 %v2984_v29 }
 0x43b   : > { %v1706_v51 = vpack.c.bf16 %v1704_v3, %v1704_v3 }
 0x43c   : > { %2352 = vmatpush.bf16.msrb.mxu3 %v3003_v57 }
 0x43d   : > { %2044 = vmatmul.bf16.vlgmr.msrb.gmra.mxu0 %v1706_v51  ;;  %2070 = vmatmul.bf16.vlgmr.msra.gmra.mxu2 %v1706_v51 }
 0x43e   : > { %2338 = vmatpush.bf16.msrb.mxu0 %v2996_v14  ;;  %2330 = vmatpush.bf16.msrb.mxu2 %v2983_v47 }
 0x440   : > { %2353 = vmatpush.bf16.msrb.mxu3 %v3002_v58 }
 0x442   : > { %2339 = vmatpush.bf16.msrb.mxu0 %v2995_v46  ;;  %2331 = vmatpush.bf16.msrb.mxu2 %v2982_v53 }
 0x444   : > { %2354 = vmatpush.bf16.msrb.mxu3 %v3001_v17 }
 0x446   : > { %2340 = vmatpush.bf16.msrb.mxu0 %v2994_v45  ;;  %2332 = vmatpush.bf16.msrb.mxu2 %v2981_v62 }
 0x447   : > { %2096 = vmatmul.bf16.vlgmr.msra.gmra.mxu3 %v1706_v51 }
 0x448   : > { %2355 = vmatpush.bf16.msrb.mxu3 %v3000_v27 }
 0x44a   : > { %2341 = vmatpush.bf16.msrb.mxu0 %v2993_v40 }
 0x44c   : > { %2356 = vmatpush.bf16.msrb.mxu3 %v2999_v44 }
 0x44d   : > { %2083 = vmatmul.bf16.vlgmr.msra.gmra.mxu0 %v1707_v41 }
 0x44e   : > { %2342 = vmatpush.bf16.msrb.mxu0 %v2992_v6 }
 0x450   : > { %2357 = vmatpush.bf16.msrb.mxu3 %v2998_v59 }
 0x452   : > { %2343 = vmatpush.bf16.msrb.mxu0 %v2991_v10 }
 0x454   : > { %2358 = vmatpush.bf16.msrb.mxu3 %v2997_v25 }
 0x456   : > { %2344 = vmatpush.bf16.msrb.mxu0 %v2990_v9 }
 0x45a   : > { %2345 = vmatpush.bf16.msrb.mxu0 %v2989_v61 }
 0x4b4   : > { %v2110_v36 = vpop.f32.mrf.mxu1 }
 0x4ba   : > { %v2045_v11 = vpop.f32.mrf.mxu0  ;;  %v2058_v49 = vpop.f32.mrf.mxu3 }
 0x4bb   : > { %v2046_v1 = vadd.f32 %v2045_v11, %v2030_v5 }
 0x4bc   : > { %v2112_v43 = vpop.f32.mrf.mxu1 }
 0x4bd   : > { %v2059_v54 = vadd.f32 %v2058_v49, %v2046_v1 }
 0x4bf   : > { %v2114_v2 = vadd.f32 3.0, %v2059_v54 }
 0x4c0   : > { %v2071_v55 = vpop.f32.mrf.mxu2 }
 0x4c1   : > { %v2117_v18 = vmax.f32 %v2114_v2, 0.0  ;;  %v2072_v7 = vadd.f32 %v2071_v55, %v2031_v8 }
 0x4c2   : > { %v2047_v21 = vpop.f32.mrf.mxu0  ;;  %v2060_v4 = vpop.f32.mrf.mxu3 }
 0x4c3   : > { %v2120_v22 = vmin.f32 %v2117_v18, 6.0 }
 0x4c5   : > { %v2123_v63 = vmul.f32 %v2120_v22, %v2059_v54 }
 0x4c7   : > { %v2126_v16 = vmul.f32 0.16666667, %v2123_v63 }
 0x4c8   : > { %v2073_v28 = vpop.f32.mrf.mxu2 }
 0x4c9   : > { %v2129_v33 = vpack.c.bf16 %v2126_v16, %v2126_v16 }
 0x4ca   : > { %v2084_v38 = vpop.f32.mrf.mxu0  ;;  %v2097_v34 = vpop.f32.mrf.mxu3 }
 0x4cb   : > { %v2085_v42 = vadd.f32 %v2084_v38, %v2072_v7  ;;  %v2098_v37 = vadd.f32 %v2097_v34, %v2032_v56  ;;  %2333 = vmatmul.bf16.vlgmr.msrb.gmra.mxu2 %v2129_v33 }
 0x4cd   : > { %v2115_v20 = vadd.f32 3.0, %v2085_v42  ;;  %v2111_v39 = vadd.f32 %v2110_v36, %v2098_v37 }
 0x4cf   : > { %v2118_v26 = vmax.f32 %v2115_v20, 0.0  ;;  %v2116_v35 = vadd.f32 3.0, %v2111_v39 }
 0x4d1   : > { %v2121_v13 = vmin.f32 %v2118_v26, 6.0  ;;  %v2119_v0 = vmax.f32 %v2116_v35, 0.0 }
 0x4d2   : > { %v2086_v50 = vpop.f32.mrf.mxu0  ;;  %v2099_v12 = vpop.f32.mrf.mxu3 }
 0x4d3   : > { %v2124_v23 = vmul.f32 %v2121_v13, %v2085_v42  ;;  %v2122_v41 = vmin.f32 %v2119_v0, 6.0 }
 0x4d5   : > { %v2127_v30 = vmul.f32 0.16666667, %v2124_v23  ;;  %v2125_v15 = vmul.f32 %v2122_v41, %v2111_v39 }
 0x4d7   : > { %v2130_v31 = vpack.c.bf16 %v2127_v30, %v2127_v30  ;;  %v2128_v48 = vmul.f32 0.16666667, %v2125_v15 }
 0x4d9   : > { %v2131_v32 = vpack.c.bf16 %v2128_v48, %v2128_v48  ;;  %2346 = vmatmul.bf16.vlgmr.msrb.gmra.mxu0 %v2130_v31 }
 0x4db   : > { %2359 = vmatmul.bf16.vlgmr.msrb.gmra.mxu3 %v2131_v32 }
 0x54e   : > { %v2334_v3 = vpop.f32.mrf.mxu2 }
 0x54f   : > { %v2335_v14 = vadd.f32 %v2334_v3, %v2180_v19 }
 0x556   : > { %v2336_v51 = vpop.f32.mrf.mxu2  ;;  %v2347_v52 = vpop.f32.mrf.mxu0 }
 0x557   : > { %v2348_v29 = vadd.f32 %v2347_v52, %v2335_v14 }
 0x55e   : > { %v2349_v24 = vpop.f32.mrf.mxu0  ;;  %v2360_v46 = vpop.f32.mrf.mxu3 }
 0x55f   : > { %v2361_v47 = vadd.f32 %v2360_v46, %v2348_v29 }
 0x561   : > { %2364 = vst [vmem:[%s598_s21] sm:$0x1] %v2361_v47 }
 0x566   : > { %v2362_v57 = vpop.f32.mrf.mxu3 }
 0x567 PF: > { %s29_s0 = sadd.s32 1, %s3036_s0  }
 0x568   : > { %p26_p4 = scmp.ge.s32.totalorder %s29_s0, 4  }
 0x56a   :  { %28 = sbr.rel (!%p26_p4) target bundleno = 5 (0x5), region = 129 }

</bundles_post_ra>
